<compile_context>
chip_gen: v5e
topology: v5e:2x2
jax: 0.10.0
libtpu: 0.0.40
codegen_flags: <defaults>
</compile_context>

<pallas_src>
import jax
import jax.numpy as jnp
from jax.experimental import pallas as pl
from jax.experimental.pallas import tpu as pltpu

LANE = 128       # feature-dim padding (vreg lane width)
ROW_TILE = 256   # node-row tile (M)
K_TILE = 256     # adjacency reduction tile (columns of Ahat)


def _pad_to(n, m):
    return ((n + m - 1) // m) * m


def _pad2d(a, rows, cols):
    return jnp.pad(a, ((0, rows - a.shape[0]), (0, cols - a.shape[1])))


# --------------------------------------------------------------------------
# Kernel 1: row/K-tiled matmul  T = H @ W   (weights kept resident per block)
# --------------------------------------------------------------------------
def _matmul_kernel(h_ref, w_ref, o_ref, acc_ref):
    k = pl.program_id(1)

    @pl.when(k == 0)
    def _():
        acc_ref[...] = jnp.zeros_like(acc_ref)

    acc_ref[...] += jnp.dot(h_ref[...], w_ref[...],
                            preferred_element_type=jnp.float32)

    @pl.when(k == pl.num_programs(1) - 1)
    def _():
        o_ref[...] = acc_ref[...].astype(o_ref.dtype)


def _matmul(h, w, *, tm=ROW_TILE, tk=LANE, out_dtype=jnp.bfloat16):
    M, K = h.shape
    _, N = w.shape
    grid = (M // tm, K // tk)
    return pl.pallas_call(
        _matmul_kernel,
        out_shape=jax.ShapeDtypeStruct((M, N), out_dtype),
        grid_spec=pltpu.PrefetchScalarGridSpec(
            num_scalar_prefetch=0,
            grid=grid,
            in_specs=[
                pl.BlockSpec((tm, tk), lambda i, k: (i, k)),
                pl.BlockSpec((tk, N), lambda i, k: (k, 0)),
            ],
            out_specs=pl.BlockSpec((tm, N), lambda i, k: (i, 0)),
            scratch_shapes=[pltpu.VMEM((tm, N), jnp.float32)],
        ),
        compiler_params=pltpu.CompilerParams(
            dimension_semantics=("parallel", "arbitrary")),
    )(h, w)


# --------------------------------------------------------------------------
# Kernel 2: row/K-tiled aggregation  relu(Ahat @ T + b)
# --------------------------------------------------------------------------
def _agg_kernel(adj_ref, t_ref, b_ref, o_ref, acc_ref):
    k = pl.program_id(1)

    @pl.when(k == 0)
    def _():
        acc_ref[...] = jnp.zeros_like(acc_ref)

    acc_ref[...] += jnp.dot(adj_ref[...], t_ref[...],
                            preferred_element_type=jnp.float32)

    @pl.when(k == pl.num_programs(1) - 1)
    def _():
        # bias add + ReLU once per output tile (finalize), not per K-step
        o_ref[...] = jnp.maximum(acc_ref[...] + b_ref[...],
                                 0.0).astype(o_ref.dtype)


def _gcn_aggregate(adj, t, b, *, tm=ROW_TILE, tk=K_TILE,
                   out_dtype=jnp.bfloat16):
    Np = adj.shape[0]
    F = t.shape[1]
    grid = (Np // tm, Np // tk)
    return pl.pallas_call(
        _agg_kernel,
        out_shape=jax.ShapeDtypeStruct((Np, F), out_dtype),
        grid_spec=pltpu.PrefetchScalarGridSpec(
            num_scalar_prefetch=0,
            grid=grid,
            in_specs=[
                pl.BlockSpec((tm, tk), lambda i, k: (i, k)),   # adj tile
                pl.BlockSpec((tk, F), lambda i, k: (k, 0)),    # rows of H@W
                pl.BlockSpec((1, F), lambda i, k: (0, 0)),     # resident bias
            ],
            out_specs=pl.BlockSpec((tm, F), lambda i, k: (i, 0)),
            scratch_shapes=[pltpu.VMEM((tm, F), jnp.float32)],
        ),
        compiler_params=pltpu.CompilerParams(
            dimension_semantics=("parallel", "arbitrary")),
    )(adj, t, b)


# --------------------------------------------------------------------------
# Kernel 3: fused MLP head  relu(H @ Wf1 + bf1) @ Wf2 + bf2  (row-tiled)
# --------------------------------------------------------------------------
def _head_kernel(h_ref, wf1_ref, bf1_ref, wf2_ref, bf2_ref, o_ref):
    h = jnp.dot(h_ref[...], wf1_ref[...], preferred_element_type=jnp.float32)
    h = jnp.maximum(h + bf1_ref[...], 0.0)
    o = jnp.dot(h.astype(wf2_ref.dtype), wf2_ref[...],
                preferred_element_type=jnp.float32) + bf2_ref[...]
    o_ref[...] = o.astype(o_ref.dtype)


def _mlp_head(h, wf1, bf1, wf2, bf2, *, tm=ROW_TILE):
    Np, Fh = h.shape
    Fm = wf1.shape[1]
    Fc = wf2.shape[1]
    return pl.pallas_call(
        _head_kernel,
        out_shape=jax.ShapeDtypeStruct((Np, Fc), jnp.float32),
        grid_spec=pltpu.PrefetchScalarGridSpec(
            num_scalar_prefetch=0,
            grid=(Np // tm,),
            in_specs=[
                pl.BlockSpec((tm, Fh), lambda i: (i, 0)),
                pl.BlockSpec((Fh, Fm), lambda i: (0, 0)),
                pl.BlockSpec((1, Fm), lambda i: (0, 0)),
                pl.BlockSpec((Fm, Fc), lambda i: (0, 0)),
                pl.BlockSpec((1, Fc), lambda i: (0, 0)),
            ],
            out_specs=pl.BlockSpec((tm, Fc), lambda i: (i, 0)),
        ),
        compiler_params=pltpu.CompilerParams(
            dimension_semantics=("parallel",)),
    )(h, wf1, bf1, wf2, bf2)


# --------------------------------------------------------------------------
# Forward wrapper: pad to TPU-friendly shapes, cast to bf16, run 5 kernels.
# --------------------------------------------------------------------------
def gcn_forward(adj, x, params):
    N, nfeat = x.shape
    nhid = params["w1"].shape[1]
    nh2 = params["wf1"].shape[1]
    nclass = params["wf2"].shape[1]

    Np = _pad_to(max(N, ROW_TILE), ROW_TILE)     # ROW_TILE == K_TILE
    Fin = _pad_to(nfeat, LANE)
    Fh = _pad_to(nhid, LANE)
    Fm = _pad_to(nh2, LANE)
    Fc = _pad_to(nclass, LANE)                   # lane-dense output slab

    cdt = jnp.bfloat16

    adj_p = _pad2d(adj, Np, Np).astype(cdt)
    x_p = _pad2d(x, Np, Fin).astype(cdt)

    w1 = _pad2d(params["w1"], Fin, Fh).astype(cdt)
    b1 = _pad2d(params["b1"], 1, Fh).astype(jnp.float32)
    w2 = _pad2d(params["w2"], Fh, Fh).astype(cdt)
    b2 = _pad2d(params["b2"], 1, Fh).astype(jnp.float32)
    wf1 = _pad2d(params["wf1"], Fh, Fm).astype(cdt)
    bf1 = _pad2d(params["bf1"], 1, Fm).astype(jnp.float32)
    wf2 = _pad2d(params["wf2"], Fm, Fc).astype(cdt)
    bf2 = _pad2d(params["bf2"], 1, Fc).astype(jnp.float32)

    # GCNConv 1: relu(Ahat @ (X @ W1) + b1)
    t1 = _matmul(x_p, w1)
    h1 = _gcn_aggregate(adj_p, t1, b1)
    # GCNConv 2: relu(Ahat @ (h1 @ W2) + b2)
    t2 = _matmul(h1, w2)
    h2 = _gcn_aggregate(adj_p, t2, b2)
    # dropout (eval mode) -> identity
    # fc1 + ReLU + fc2 (fused head), padded f32 slab, then slice.
    out_p = _mlp_head(h2, wf1, bf1, wf2, bf2)
    return out_p[:N, :nclass]


# --------------------------------------------------------------------------
# Pure-JAX reference, graph construction, parameter init
# --------------------------------------------------------------------------
def gcn_reference(adj, x, params):
    h = jnp.maximum(adj @ (x @ params["w1"]) + params["b1"], 0.0)
    h = jnp.maximum(adj @ (h @ params["w2"]) + params["b2"], 0.0)
    h = jnp.maximum(h @ params["wf1"] + params["bf1"], 0.0)
    return h @ params["wf2"] + params["bf2"]


def build_norm_adj(edge_index, num_nodes):
    """Dense GCN-normalized adjacency: D^-1/2 (A + I) D^-1/2."""
    src = edge_index[0]
    dst = edge_index[1]
    A = jnp.zeros((num_nodes, num_nodes), jnp.float32)
    A = A.at[dst, src].add(1.0)                     # message j -> i
    A = A + jnp.eye(num_nodes, dtype=jnp.float32)   # self-loops
    deg = A.sum(axis=1)
    dinv = jax.lax.rsqrt(jnp.maximum(deg, 1e-12))
    return A * dinv[:, None] * dinv[None, :]


def init_params(key, nfeat, nhid, nclass):
    ks = jax.random.split(key, 6)

    def glorot(k, fan_in, fan_out):
        lim = (6.0 / (fan_in + fan_out)) ** 0.5
        return jax.random.uniform(k, (fan_in, fan_out), jnp.float32, -lim, lim)

    nh2 = nhid // 2
    return {
        # GCNConv layers (weight [in, out], bias broadcast as [1, out])
        "w1": glorot(ks[0], nfeat, nhid),
        "b1": jnp.zeros((1, nhid), jnp.float32),
        "w2": glorot(ks[1], nhid, nhid),
        "b2": jnp.zeros((1, nhid), jnp.float32),
        # Linear layers (torch stores [out, in]; kept transposed [in, out])
        "wf1": glorot(ks[2], nhid, nh2),
        "bf1": jax.random.uniform(ks[3], (1, nh2), jnp.float32,
                                  -(1.0 / nhid) ** 0.5, (1.0 / nhid) ** 0.5),
        "wf2": glorot(ks[4], nh2, nclass),
        "bf2": jax.random.uniform(ks[5], (1, nclass), jnp.float32,
                                  -(1.0 / nh2) ** 0.5, (1.0 / nh2) ** 0.5),
    }


if __name__ == "__main__":
    key = jax.random.PRNGKey(0)
    k_feat, k_params = jax.random.split(key)

    # Small, forward-consistent shapes.
    N, nfeat, nhid, nclass = 16, 16, 32, 4
    dropout = 0.5  # unused at inference

    # Node features.
    x = jax.random.normal(k_feat, (N, nfeat), jnp.float32)

    # Deterministic ring graph (bidirectional), edge_index shape [2, 2N].
    idx = jnp.arange(N)
    nxt = (idx + 1) % N
    edge_index = jnp.stack([jnp.concatenate([idx, nxt]),
                            jnp.concatenate([nxt, idx])], axis=0)

    adj = build_norm_adj(edge_index, N)
    params = init_params(k_params, nfeat, nhid, nclass)

    out = jax.jit(gcn_forward)(adj, x, params)
    out = jax.block_until_ready(out)

    assert out.shape == (N, nclass)
    assert jnp.all(jnp.isfinite(out))

    # bf16 compute / f32 accumulation -> loose tolerance vs f32 reference.
    ref = gcn_reference(adj, x, params)
    assert jnp.allclose(out, ref, rtol=1e-1, atol=1e-1)

    print("KERNEL_OK")
</pallas_src>

<mosaic_0001>
module attributes {stable_mosaic.version = 11 : i64} {
  func.func @_matmul_kernel(%arg0: i32, %arg1: i32, %arg2: memref<256x128xbf16, #tpu.memory_space<vmem>>, %arg3: memref<128x128xbf16, #tpu.memory_space<vmem>>, %arg4: memref<256x128xbf16, #tpu.memory_space<vmem>>, %arg5: memref<256x128xf32, #tpu.memory_space<vmem>>) attributes {dimension_semantics = [#tpu.dimension_semantics<parallel>, #tpu.dimension_semantics<arbitrary>], iteration_bounds = array<i64: 1, 1>, scalar_prefetch = 0 : i64, scratch_operands = 1 : i64, tpu.core_type = #tpu.core_type<tc>, window_params = [{transform_indices = @transform_0, window_bounds = array<i64: 256, 128>}, {transform_indices = @transform_1, window_bounds = array<i64: 128, 128>}, {transform_indices = @transform_2, window_bounds = array<i64: 256, 128>}]} {
    %c0_i32 = arith.constant 0 : i32
    %0 = arith.cmpi eq, %arg1, %c0_i32 : i32
    %1 = arith.extui %0 : i1 to i32
    %c0_i32_0 = arith.constant 0 : i32
    %2 = arith.cmpi ne, %1, %c0_i32_0 : i32
    scf.if %2 {
      %cst_10 = arith.constant 0.000000e+00 : f32
      %12 = vector.broadcast %cst_10 : f32 to vector<256x128xf32>
      %c0_11 = arith.constant 0 : index
      %c0_12 = arith.constant 0 : index
      %13 = vector.load %arg5[%c0_11, %c0_12] : memref<256x128xf32, #tpu.memory_space<vmem>>, vector<256x128xf32>
      tpu.vector_store %arg5[%c0_11, %c0_12], %12 {strides = array<i32>} : memref<256x128xf32, #tpu.memory_space<vmem>>, vector<256x128xf32>,
    } else {
    }
    %c0 = arith.constant 0 : index
    %c0_1 = arith.constant 0 : index
    %3 = vector.load %arg5[%c0, %c0_1] : memref<256x128xf32, #tpu.memory_space<vmem>>, vector<256x128xf32>
    %c0_2 = arith.constant 0 : index
    %c0_3 = arith.constant 0 : index
    %4 = vector.load %arg2[%c0_2, %c0_3] : memref<256x128xbf16, #tpu.memory_space<vmem>>, vector<256x128xbf16>
    %c0_4 = arith.constant 0 : index
    %c0_5 = arith.constant 0 : index
    %5 = vector.load %arg3[%c0_4, %c0_5] : memref<128x128xbf16, #tpu.memory_space<vmem>>, vector<128x128xbf16>
    %cst = arith.constant dense<0.000000e+00> : vector<256x128xf32>
    %6 = tpu.matmul %4, %5, %cst {dimension_numbers = #tpu.dot_dimension_numbers<[1], [0], [0], [1], [0, 0, 1, 1], [], []>} : vector<256x128xbf16>, vector<128x128xbf16>, vector<256x128xf32> -> vector<256x128xf32>
    %7 = arith.addf %3, %6 : vector<256x128xf32>
    %c0_6 = arith.constant 0 : index
    %c0_7 = arith.constant 0 : index
    %8 = vector.load %arg5[%c0_6, %c0_7] : memref<256x128xf32, #tpu.memory_space<vmem>>, vector<256x128xf32>
    tpu.vector_store %arg5[%c0_6, %c0_7], %7 {strides = array<i32>} : memref<256x128xf32, #tpu.memory_space<vmem>>, vector<256x128xf32>,
    %c0_i32_8 = arith.constant 0 : i32
    %9 = arith.cmpi eq, %arg1, %c0_i32_8 : i32
    %10 = arith.extui %9 : i1 to i32
    %c0_i32_9 = arith.constant 0 : i32
    %11 = arith.cmpi ne, %10, %c0_i32_9 : i32
    scf.if %11 {
      %c0_10 = arith.constant 0 : index
      %c0_11 = arith.constant 0 : index
      %12 = vector.load %arg5[%c0_10, %c0_11] : memref<256x128xf32, #tpu.memory_space<vmem>>, vector<256x128xf32>
      %13 = arith.truncf %12 : vector<256x128xf32> to vector<256x128xbf16>
      %c0_12 = arith.constant 0 : index
      %c0_13 = arith.constant 0 : index
      %14 = vector.load %arg4[%c0_12, %c0_13] : memref<256x128xbf16, #tpu.memory_space<vmem>>, vector<256x128xbf16>
      tpu.vector_store %arg4[%c0_12, %c0_13], %13 {strides = array<i32>} : memref<256x128xbf16, #tpu.memory_space<vmem>>, vector<256x128xbf16>,
    } else {
    }
    return
  }
  func.func @transform_0(%arg0: i32, %arg1: i32) -> (i32, i32) {
    %c0_i32 = arith.constant 0 : i32
    return %arg0, %arg1 : i32, i32
  }
  func.func @transform_1(%arg0: i32, %arg1: i32) -> (i32, i32) {
    %c0_i32 = arith.constant 0 : i32
    %c0_i32_0 = arith.constant 0 : i32
    return %arg1, %c0_i32 : i32, i32
  }
  func.func @transform_2(%arg0: i32, %arg1: i32) -> (i32, i32) {
    %c0_i32 = arith.constant 0 : i32
    %c0_i32_0 = arith.constant 0 : i32
    return %arg0, %c0_i32 : i32, i32
  }
}

module attributes {stable_mosaic.version = 11 : i64} {
  func.func @_agg_kernel(%arg0: i32, %arg1: i32, %arg2: memref<256x256xbf16, #tpu.memory_space<vmem>>, %arg3: memref<256x128xbf16, #tpu.memory_space<vmem>>, %arg4: memref<1x128xf32, #tpu.memory_space<vmem>>, %arg5: memref<256x128xbf16, #tpu.memory_space<vmem>>, %arg6: memref<256x128xf32, #tpu.memory_space<vmem>>) attributes {dimension_semantics = [#tpu.dimension_semantics<parallel>, #tpu.dimension_semantics<arbitrary>], iteration_bounds = array<i64: 1, 1>, scalar_prefetch = 0 : i64, scratch_operands = 1 : i64, tpu.core_type = #tpu.core_type<tc>, window_params = [{transform_indices = @transform_0, window_bounds = array<i64: 256, 256>}, {transform_indices = @transform_1, window_bounds = array<i64: 256, 128>}, {pipeline_mode = #tpu.pipeline_mode<synchronous>, transform_indices = @transform_2, window_bounds = array<i64: 1, 128>}, {transform_indices = @transform_3, window_bounds = array<i64: 256, 128>}]} {
    %c0_i32 = arith.constant 0 : i32
    %0 = arith.cmpi eq, %arg1, %c0_i32 : i32
    %1 = arith.extui %0 : i1 to i32
    %c0_i32_0 = arith.constant 0 : i32
    %2 = arith.cmpi ne, %1, %c0_i32_0 : i32
    scf.if %2 {
      %cst_10 = arith.constant 0.000000e+00 : f32
      %12 = vector.broadcast %cst_10 : f32 to vector<256x128xf32>
      %c0_11 = arith.constant 0 : index
      %c0_12 = arith.constant 0 : index
      %13 = vector.load %arg6[%c0_11, %c0_12] : memref<256x128xf32, #tpu.memory_space<vmem>>, vector<256x128xf32>
      tpu.vector_store %arg6[%c0_11, %c0_12], %12 {strides = array<i32>} : memref<256x128xf32, #tpu.memory_space<vmem>>, vector<256x128xf32>,
    } else {
    }
    %c0 = arith.constant 0 : index
    %c0_1 = arith.constant 0 : index
    %3 = vector.load %arg6[%c0, %c0_1] : memref<256x128xf32, #tpu.memory_space<vmem>>, vector<256x128xf32>
    %c0_2 = arith.constant 0 : index
    %c0_3 = arith.constant 0 : index
    %4 = vector.load %arg2[%c0_2, %c0_3] : memref<256x256xbf16, #tpu.memory_space<vmem>>, vector<256x256xbf16>
    %c0_4 = arith.constant 0 : index
    %c0_5 = arith.constant 0 : index
    %5 = vector.load %arg3[%c0_4, %c0_5] : memref<256x128xbf16, #tpu.memory_space<vmem>>, vector<256x128xbf16>
    %cst = arith.constant dense<0.000000e+00> : vector<256x128xf32>
    %6 = tpu.matmul %4, %5, %cst {dimension_numbers = #tpu.dot_dimension_numbers<[1], [0], [0], [1], [0, 0, 1, 1], [], []>} : vector<256x256xbf16>, vector<256x128xbf16>, vector<256x128xf32> -> vector<256x128xf32>
    %7 = arith.addf %3, %6 : vector<256x128xf32>
    %c0_6 = arith.constant 0 : index
    %c0_7 = arith.constant 0 : index
    %8 = vector.load %arg6[%c0_6, %c0_7] : memref<256x128xf32, #tpu.memory_space<vmem>>, vector<256x128xf32>
    tpu.vector_store %arg6[%c0_6, %c0_7], %7 {strides = array<i32>} : memref<256x128xf32, #tpu.memory_space<vmem>>, vector<256x128xf32>,
    %c0_i32_8 = arith.constant 0 : i32
    %9 = arith.cmpi eq, %arg1, %c0_i32_8 : i32
    %10 = arith.extui %9 : i1 to i32
    %c0_i32_9 = arith.constant 0 : i32
    %11 = arith.cmpi ne, %10, %c0_i32_9 : i32
    scf.if %11 {
      %c0_10 = arith.constant 0 : index
      %c0_11 = arith.constant 0 : index
      %12 = vector.load %arg6[%c0_10, %c0_11] : memref<256x128xf32, #tpu.memory_space<vmem>>, vector<256x128xf32>
      %c0_12 = arith.constant 0 : index
      %c0_13 = arith.constant 0 : index
      %13 = vector.load %arg4[%c0_12, %c0_13] : memref<1x128xf32, #tpu.memory_space<vmem>>, vector<1x128xf32>
      %14 = vector.broadcast %13 : vector<1x128xf32> to vector<256x128xf32>
      %15 = arith.addf %12, %14 : vector<256x128xf32>
      %cst_14 = arith.constant 0.000000e+00 : f32
      %16 = vector.broadcast %cst_14 : f32 to vector<256x128xf32>
      %17 = arith.maximumf %15, %16 : vector<256x128xf32>
      %18 = arith.truncf %17 : vector<256x128xf32> to vector<256x128xbf16>
      %c0_15 = arith.constant 0 : index
      %c0_16 = arith.constant 0 : index
      %19 = vector.load %arg5[%c0_15, %c0_16] : memref<256x128xbf16, #tpu.memory_space<vmem>>, vector<256x128xbf16>
      tpu.vector_store %arg5[%c0_15, %c0_16], %18 {strides = array<i32>} : memref<256x128xbf16, #tpu.memory_space<vmem>>, vector<256x128xbf16>,
    } else {
    }
    return
  }
  func.func @transform_0(%arg0: i32, %arg1: i32) -> (i32, i32) {
    %c0_i32 = arith.constant 0 : i32
    return %arg0, %arg1 : i32, i32
  }
  func.func @transform_1(%arg0: i32, %arg1: i32) -> (i32, i32) {
    %c0_i32 = arith.constant 0 : i32
    %c0_i32_0 = arith.constant 0 : i32
    return %arg1, %c0_i32 : i32, i32
  }
  func.func @transform_2(%arg0: i32, %arg1: i32) -> (i32, i32) {
    %c0_i32 = arith.constant 0 : i32
    %c0_i32_0 = arith.constant 0 : i32
    %c0_i32_1 = arith.constant 0 : i32
    return %c0_i32, %c0_i32_0 : i32, i32
  }
  func.func @transform_3(%arg0: i32, %arg1: i32) -> (i32, i32) {
    %c0_i32 = arith.constant 0 : i32
    %c0_i32_0 = arith.constant 0 : i32
    return %arg0, %c0_i32 : i32, i32
  }
}

module attributes {stable_mosaic.version = 11 : i64} {
  func.func @_head_kernel(%arg0: i32, %arg1: memref<256x128xbf16, #tpu.memory_space<vmem>>, %arg2: memref<128x128xbf16, #tpu.memory_space<vmem>>, %arg3: memref<1x128xf32, #tpu.memory_space<vmem>>, %arg4: memref<128x128xbf16, #tpu.memory_space<vmem>>, %arg5: memref<1x128xf32, #tpu.memory_space<vmem>>, %arg6: memref<256x128xf32, #tpu.memory_space<vmem>>) attributes {dimension_semantics = [#tpu.dimension_semantics<parallel>], iteration_bounds = array<i64: 1>, scalar_prefetch = 0 : i64, scratch_operands = 0 : i64, tpu.core_type = #tpu.core_type<tc>, window_params = [{transform_indices = @transform_0, window_bounds = array<i64: 256, 128>}, {pipeline_mode = #tpu.pipeline_mode<synchronous>, transform_indices = @transform_1, window_bounds = array<i64: 128, 128>}, {pipeline_mode = #tpu.pipeline_mode<synchronous>, transform_indices = @transform_2, window_bounds = array<i64: 1, 128>}, {pipeline_mode = #tpu.pipeline_mode<synchronous>, transform_indices = @transform_3, window_bounds = array<i64: 128, 128>}, {pipeline_mode = #tpu.pipeline_mode<synchronous>, transform_indices = @transform_4, window_bounds = array<i64: 1, 128>}, {transform_indices = @transform_5, window_bounds = array<i64: 256, 128>}]} {
    %c0 = arith.constant 0 : index
    %c0_0 = arith.constant 0 : index
    %0 = vector.load %arg1[%c0, %c0_0] : memref<256x128xbf16, #tpu.memory_space<vmem>>, vector<256x128xbf16>
    %c0_1 = arith.constant 0 : index
    %c0_2 = arith.constant 0 : index
    %1 = vector.load %arg2[%c0_1, %c0_2] : memref<128x128xbf16, #tpu.memory_space<vmem>>, vector<128x128xbf16>
    %cst = arith.constant dense<0.000000e+00> : vector<256x128xf32>
    %2 = tpu.matmul %0, %1, %cst {dimension_numbers = #tpu.dot_dimension_numbers<[1], [0], [0], [1], [0, 0, 1, 1], [], []>} : vector<256x128xbf16>, vector<128x128xbf16>, vector<256x128xf32> -> vector<256x128xf32>
    %c0_3 = arith.constant 0 : index
    %c0_4 = arith.constant 0 : index
    %3 = vector.load %arg3[%c0_3, %c0_4] : memref<1x128xf32, #tpu.memory_space<vmem>>, vector<1x128xf32>
    %4 = vector.broadcast %3 : vector<1x128xf32> to vector<256x128xf32>
    %5 = arith.addf %2, %4 : vector<256x128xf32>
    %cst_5 = arith.constant 0.000000e+00 : f32
    %6 = vector.broadcast %cst_5 : f32 to vector<256x128xf32>
    %7 = arith.maximumf %5, %6 : vector<256x128xf32>
    %8 = arith.truncf %7 : vector<256x128xf32> to vector<256x128xbf16>
    %c0_6 = arith.constant 0 : index
    %c0_7 = arith.constant 0 : index
    %9 = vector.load %arg4[%c0_6, %c0_7] : memref<128x128xbf16, #tpu.memory_space<vmem>>, vector<128x128xbf16>
    %cst_8 = arith.constant dense<0.000000e+00> : vector<256x128xf32>
    %10 = tpu.matmul %8, %9, %cst_8 {dimension_numbers = #tpu.dot_dimension_numbers<[1], [0], [0], [1], [0, 0, 1, 1], [], []>} : vector<256x128xbf16>, vector<128x128xbf16>, vector<256x128xf32> -> vector<256x128xf32>
    %c0_9 = arith.constant 0 : index
    %c0_10 = arith.constant 0 : index
    %11 = vector.load %arg5[%c0_9, %c0_10] : memref<1x128xf32, #tpu.memory_space<vmem>>, vector<1x128xf32>
    %12 = vector.broadcast %11 : vector<1x128xf32> to vector<256x128xf32>
    %13 = arith.addf %10, %12 : vector<256x128xf32>
    %c0_11 = arith.constant 0 : index
    %c0_12 = arith.constant 0 : index
    %14 = vector.load %arg6[%c0_11, %c0_12] : memref<256x128xf32, #tpu.memory_space<vmem>>, vector<256x128xf32>
    tpu.vector_store %arg6[%c0_11, %c0_12], %13 {strides = array<i32>} : memref<256x128xf32, #tpu.memory_space<vmem>>, vector<256x128xf32>,
    return
  }
  func.func @transform_0(%arg0: i32) -> (i32, i32) {
    %c0_i32 = arith.constant 0 : i32
    %c0_i32_0 = arith.constant 0 : i32
    return %arg0, %c0_i32 : i32, i32
  }
  func.func @transform_1(%arg0: i32) -> (i32, i32) {
    %c0_i32 = arith.constant 0 : i32
    %c0_i32_0 = arith.constant 0 : i32
    %c0_i32_1 = arith.constant 0 : i32
    return %c0_i32, %c0_i32_0 : i32, i32
  }
  func.func @transform_2(%arg0: i32) -> (i32, i32) {
    %c0_i32 = arith.constant 0 : i32
    %c0_i32_0 = arith.constant 0 : i32
    %c0_i32_1 = arith.constant 0 : i32
    return %c0_i32, %c0_i32_0 : i32, i32
  }
  func.func @transform_3(%arg0: i32) -> (i32, i32) {
    %c0_i32 = arith.constant 0 : i32
    %c0_i32_0 = arith.constant 0 : i32
    %c0_i32_1 = arith.constant 0 : i32
    return %c0_i32, %c0_i32_0 : i32, i32
  }
  func.func @transform_4(%arg0: i32) -> (i32, i32) {
    %c0_i32 = arith.constant 0 : i32
    %c0_i32_0 = arith.constant 0 : i32
    %c0_i32_1 = arith.constant 0 : i32
    return %c0_i32, %c0_i32_0 : i32, i32
  }
  func.func @transform_5(%arg0: i32) -> (i32, i32) {
    %c0_i32 = arith.constant 0 : i32
    %c0_i32_0 = arith.constant 0 : i32
    return %arg0, %c0_i32 : i32, i32
  }
}

</mosaic_0001>

<bundles_post_ra>
// kernel: gcn_forward.5
= control target key start
LH: loop header
LB: loop body
LE: loop exit
PB: predicated region body
PF: predicated region fallthrough
CT: control target
= control target key end

     0   :  { %s901_s1 = inlined_call_operand.vmem [shape: bf16[128,128], index: 1, kind: input, shape index: {}]   ;;  %s902_s0 = inlined_call_operand.vmem [shape: bf16[256,128], index: 0, kind: input, shape index: {}]   ;;  %s903_s2 = inlined_call_operand.vmem [shape: bf16[256,128], index: 2, kind: output, shape index: {}]  }
   0x1   :  { %v646_v0 = vld [vmem:[%s901_s1 + $0x38] sm:$0xff]  ;;  %v645_v1 = vld [vmem:[%s901_s1 + $0x30] sm:$0xff]  ;;  %v644_v2 = vld [vmem:[%s901_s1 + $0x28] sm:$0xff] }
   0x2   :  { %271 = vmatpush.bf16.msra.mxu0 %v646_v0  ;;  %742 = vmatpush.bf16.msra.mxu1 %v646_v0  ;;  %v643_v3 = vld [vmem:[%s901_s1 + $0x20] sm:$0xff]  ;;  %v642_v4 = vld [vmem:[%s901_s1 + $0x18] sm:$0xff]  ;;  %v641_v5 = vld [vmem:[%s901_s1 + $0x10] sm:$0xff] }
   0x3   :  { %743 = vmatpush.bf16.msra.mxu2 %v646_v0  ;;  %744 = vmatpush.bf16.msra.mxu3 %v646_v0  ;;  %v640_v6 = vld [vmem:[%s901_s1 + $0x8] sm:$0xff]  ;;  %v639_v7 = vld [vmem:[%s901_s1] sm:$0xff]  ;;  %v625_v16 = vld [vmem:[%s902_s0 + $0x10] sm:$0xff] }
   0x4   :  { %v623_v8 = vld [vmem:[%s902_s0] sm:$0xff]  ;;  %v624_v12 = vld [vmem:[%s902_s0 + $0x8] sm:$0xff]  ;;  %v629_v17 = vld [vmem:[%s902_s0 + $0x30] sm:$0xff] }
   0x5   :  { %v627_v9 = vld [vmem:[%s902_s0 + $0x20] sm:$0xff]  ;;  %v628_v13 = vld [vmem:[%s902_s0 + $0x28] sm:$0xff]  ;;  %v633_v18 = vld [vmem:[%s902_s0 + $0x50] sm:$0xff] }
   0x6   :  { %272 = vmatpush.bf16.msra.mxu0 %v645_v1  ;;  %745 = vmatpush.bf16.msra.mxu1 %v645_v1  ;;  %v631_v10 = vld [vmem:[%s902_s0 + $0x40] sm:$0xff]  ;;  %v632_v14 = vld [vmem:[%s902_s0 + $0x48] sm:$0xff]  ;;  %v637_v19 = vld [vmem:[%s902_s0 + $0x70] sm:$0xff] }
   0x7   :  { %746 = vmatpush.bf16.msra.mxu2 %v645_v1  ;;  %747 = vmatpush.bf16.msra.mxu3 %v645_v1  ;;  %v635_v11 = vld [vmem:[%s902_s0 + $0x60] sm:$0xff]  ;;  %v636_v15 = vld [vmem:[%s902_s0 + $0x68] sm:$0xff]  ;;  %v626_v20 = vld [vmem:[%s902_s0 + $0x18] sm:$0xff] }
   0x8   :  { %v630_v21 = vld [vmem:[%s902_s0 + $0x38] sm:$0xff] }
   0x9   :  { %v634_v22 = vld [vmem:[%s902_s0 + $0x58] sm:$0xff] }
   0xa   :  { %273 = vmatpush.bf16.msra.mxu0 %v644_v2  ;;  %748 = vmatpush.bf16.msra.mxu1 %v644_v2  ;;  %v638_v23 = vld [vmem:[%s902_s0 + $0x78] sm:$0xff] }
   0xb   :  { %749 = vmatpush.bf16.msra.mxu2 %v644_v2  ;;  %750 = vmatpush.bf16.msra.mxu3 %v644_v2 }
   0xe   :  { %274 = vmatpush.bf16.msra.mxu0 %v643_v3  ;;  %751 = vmatpush.bf16.msra.mxu1 %v643_v3 }
   0xf   :  { %752 = vmatpush.bf16.msra.mxu2 %v643_v3  ;;  %753 = vmatpush.bf16.msra.mxu3 %v643_v3 }
  0x12   :  { %275 = vmatpush.bf16.msra.mxu0 %v642_v4  ;;  %754 = vmatpush.bf16.msra.mxu1 %v642_v4 }
  0x13   :  { %755 = vmatpush.bf16.msra.mxu2 %v642_v4  ;;  %756 = vmatpush.bf16.msra.mxu3 %v642_v4 }
  0x16   :  { %276 = vmatpush.bf16.msra.mxu0 %v641_v5  ;;  %757 = vmatpush.bf16.msra.mxu1 %v641_v5 }
  0x17   :  { %758 = vmatpush.bf16.msra.mxu2 %v641_v5  ;;  %759 = vmatpush.bf16.msra.mxu3 %v641_v5 }
  0x1a   :  { %277 = vmatpush.bf16.msra.mxu0 %v640_v6  ;;  %760 = vmatpush.bf16.msra.mxu1 %v640_v6 }
  0x1b   :  { %761 = vmatpush.bf16.msra.mxu2 %v640_v6  ;;  %762 = vmatpush.bf16.msra.mxu3 %v640_v6 }
  0x1e   :  { %278 = vmatpush.bf16.msra.mxu0 %v639_v7  ;;  %763 = vmatpush.bf16.msra.mxu1 %v639_v7 }
  0x1f   :  { %764 = vmatpush.bf16.msra.mxu2 %v639_v7  ;;  %765 = vmatpush.bf16.msra.mxu3 %v639_v7 }
  0x21   :  { %279 = vmatmul.bf16.vlgmr.msra.gmra.mxu0 %v623_v8  ;;  %299 = vmatmul.bf16.vlgmr.msra.gmra.mxu1 %v627_v9 }
  0x22   :  { %319 = vmatmul.bf16.vlgmr.msra.gmra.mxu2 %v631_v10  ;;  %339 = vmatmul.bf16.vlgmr.msra.gmra.mxu3 %v635_v11 }
  0x31   :  { %284 = vmatmul.bf16.gmra.mxu0 %v624_v12  ;;  %304 = vmatmul.bf16.gmra.mxu1 %v628_v13 }
  0x32   :  { %324 = vmatmul.bf16.gmra.mxu2 %v632_v14  ;;  %344 = vmatmul.bf16.gmra.mxu3 %v636_v15 }
  0x41   :  { %289 = vmatmul.bf16.gmra.mxu0 %v625_v16  ;;  %309 = vmatmul.bf16.gmra.mxu1 %v629_v17 }
  0x42   :  { %329 = vmatmul.bf16.gmra.mxu2 %v633_v18  ;;  %349 = vmatmul.bf16.gmra.mxu3 %v637_v19 }
  0x51   :  { %294 = vmatmul.bf16.gmra.mxu0 %v626_v20  ;;  %314 = vmatmul.bf16.gmra.mxu1 %v630_v21 }
  0x52   :  { %334 = vmatmul.bf16.gmra.mxu2 %v634_v22  ;;  %354 = vmatmul.bf16.gmra.mxu3 %v638_v23 }
  0x9e   :  { %v280_v24 = vpop.f32.mrf.mxu0  ;;  %v300_v25 = vpop.f32.mrf.mxu1 }
  0xa5   :  { %v320_v26 = vpop.f32.mrf.mxu2  ;;  %v340_v27 = vpop.f32.mrf.mxu3 }
  0xa6   :  { %v282_v28 = vpop.f32.mrf.mxu0  ;;  %v302_v29 = vpop.f32.mrf.mxu1 }
  0xa7   :  { %v650_v30 = vpack.c.bf16 %v282_v28, %v280_v24  ;;  %v670_v31 = vpack.c.bf16 %v302_v29, %v300_v25 }
  0xa9   :  { %651 = vst [vmem:[%s903_s2] sm:$0xff] %v650_v30  }
  0xaa   :  { %730 = vst [vmem:[%s903_s2 + $0x20] sm:$0xff] %v670_v31  }
  0xad   :  { %v322_v32 = vpop.f32.mrf.mxu2  ;;  %v342_v33 = vpop.f32.mrf.mxu3 }
  0xae   :  { %v690_v34 = vpack.c.bf16 %v322_v32, %v320_v26  ;;  %v710_v35 = vpack.c.bf16 %v342_v33, %v340_v27  ;;  %v285_v36 = vpop.f32.mrf.mxu0  ;;  %v305_v37 = vpop.f32.mrf.mxu1 }
  0xb0   :  { %734 = vst [vmem:[%s903_s2 + $0x40] sm:$0xff] %v690_v34  }
  0xb1   :  { %738 = vst [vmem:[%s903_s2 + $0x60] sm:$0xff] %v710_v35  }
  0xb5   :  { %v325_v38 = vpop.f32.mrf.mxu2  ;;  %v345_v39 = vpop.f32.mrf.mxu3 }
  0xb6   :  { %v287_v40 = vpop.f32.mrf.mxu0  ;;  %v307_v41 = vpop.f32.mrf.mxu1 }
  0xb7   :  { %v655_v42 = vpack.c.bf16 %v287_v40, %v285_v36  ;;  %v675_v43 = vpack.c.bf16 %v307_v41, %v305_v37 }
  0xb9   :  { %727 = vst [vmem:[%s903_s2 + $0x8] sm:$0xff] %v655_v42  }
  0xba   :  { %731 = vst [vmem:[%s903_s2 + $0x28] sm:$0xff] %v675_v43  }
  0xbd   :  { %v327_v44 = vpop.f32.mrf.mxu2  ;;  %v347_v45 = vpop.f32.mrf.mxu3 }
  0xbe   :  { %v695_v46 = vpack.c.bf16 %v327_v44, %v325_v38  ;;  %v715_v47 = vpack.c.bf16 %v347_v45, %v345_v39  ;;  %v290_v48 = vpop.f32.mrf.mxu0  ;;  %v310_v49 = vpop.f32.mrf.mxu1 }
  0xc0   :  { %735 = vst [vmem:[%s903_s2 + $0x48] sm:$0xff] %v695_v46  }
  0xc1   :  { %739 = vst [vmem:[%s903_s2 + $0x68] sm:$0xff] %v715_v47  }
  0xc5   :  { %v330_v50 = vpop.f32.mrf.mxu2  ;;  %v350_v51 = vpop.f32.mrf.mxu3 }
  0xc6   :  { %v292_v52 = vpop.f32.mrf.mxu0  ;;  %v312_v53 = vpop.f32.mrf.mxu1 }
  0xc7   :  { %v660_v54 = vpack.c.bf16 %v292_v52, %v290_v48  ;;  %v680_v55 = vpack.c.bf16 %v312_v53, %v310_v49 }
  0xc9   :  { %728 = vst [vmem:[%s903_s2 + $0x10] sm:$0xff] %v660_v54  }
  0xca   :  { %732 = vst [vmem:[%s903_s2 + $0x30] sm:$0xff] %v680_v55  }
  0xcd   :  { %v332_v56 = vpop.f32.mrf.mxu2  ;;  %v352_v57 = vpop.f32.mrf.mxu3 }
  0xce   :  { %v700_v58 = vpack.c.bf16 %v332_v56, %v330_v50  ;;  %v720_v59 = vpack.c.bf16 %v352_v57, %v350_v51  ;;  %v295_v60 = vpop.f32.mrf.mxu0  ;;  %v315_v61 = vpop.f32.mrf.mxu1 }
  0xd0   :  { %736 = vst [vmem:[%s903_s2 + $0x50] sm:$0xff] %v700_v58  }
  0xd1   :  { %740 = vst [vmem:[%s903_s2 + $0x70] sm:$0xff] %v720_v59  }
  0xd5   :  { %v335_v62 = vpop.f32.mrf.mxu2  ;;  %v355_v63 = vpop.f32.mrf.mxu3 }
  0xd6   :  { %v297_v0 = vpop.f32.mrf.mxu0  ;;  %v317_v1 = vpop.f32.mrf.mxu1 }
  0xd7   :  { %v665_v2 = vpack.c.bf16 %v297_v0, %v295_v60  ;;  %v685_v3 = vpack.c.bf16 %v317_v1, %v315_v61 }
  0xd9   :  { %729 = vst [vmem:[%s903_s2 + $0x18] sm:$0xff] %v665_v2  }
  0xda   :  { %733 = vst [vmem:[%s903_s2 + $0x38] sm:$0xff] %v685_v3  }
  0xdd   :  { %v337_v4 = vpop.f32.mrf.mxu2  ;;  %v357_v5 = vpop.f32.mrf.mxu3 }
  0xde   :  { %v705_v6 = vpack.c.bf16 %v337_v4, %v335_v62  ;;  %v725_v7 = vpack.c.bf16 %v357_v5, %v355_v63 }
  0xe0   :  { %737 = vst [vmem:[%s903_s2 + $0x58] sm:$0xff] %v705_v6  }
  0xe1   :  { %741 = vst [vmem:[%s903_s2 + $0x78] sm:$0xff] %v725_v7  }

// kernel: gcn_forward.9
= control target key start
LH: loop header
LB: loop body
LE: loop exit
PB: predicated region body
PF: predicated region fallthrough
CT: control target
= control target key end

     0   :  { %s1020_s1 = inlined_call_operand.vmem [shape: bf16[128,128], index: 1, kind: input, shape index: {}]   ;;  %s1021_s2 = inlined_call_operand.vmem [shape: f32[1,128], index: 2, kind: input, shape index: {}]   ;;  %s1022_s0 = inlined_call_operand.vmem [shape: bf16[256,128], index: 0, kind: input, shape index: {}]   ;;  %s1023_s3 = inlined_call_operand.vmem [shape: bf16[128,128], index: 3, kind: input, shape index: {}]   ;;  %s1024_s4 = inlined_call_operand.vmem [shape: f32[1,128], index: 4, kind: input, shape index: {}]   ;;  %s1025_s5 = inlined_call_operand.vmem [shape: f32[256,128], index: 5, kind: output, shape index: {}]  }
   0x1   :  { %v697_v0 = vld [vmem:[%s1020_s1 + $0x38] sm:$0xff]  ;;  %v696_v1 = vld [vmem:[%s1020_s1 + $0x30] sm:$0xff]  ;;  %v695_v2 = vld [vmem:[%s1020_s1 + $0x28] sm:$0xff] }
   0x2   :  { %216 = vmatpush.bf16.msra.mxu0 %v697_v0  ;;  %706 = vmatpush.bf16.msra.mxu2 %v697_v0  ;;  %v694_v3 = vld [vmem:[%s1020_s1 + $0x20] sm:$0xff]  ;;  %v693_v4 = vld [vmem:[%s1020_s1 + $0x18] sm:$0xff]  ;;  %v692_v5 = vld [vmem:[%s1020_s1 + $0x10] sm:$0xff] }
   0x3   :  { %v691_v6 = vld [vmem:[%s1020_s1 + $0x8] sm:$0xff]  ;;  %v690_v7 = vld [vmem:[%s1020_s1] sm:$0xff]  ;;  %v676_v12 = vld [vmem:[%s1022_s0 + $0x10] sm:$0xff] }
   0x4   :  { %v674_v8 = vld [vmem:[%s1022_s0] sm:$0xff]  ;;  %v675_v10 = vld [vmem:[%s1022_s0 + $0x8] sm:$0xff]  ;;  %v684_v13 = vld [vmem:[%s1022_s0 + $0x50] sm:$0xff] }
   0x5   :  { %v682_v9 = vld [vmem:[%s1022_s0 + $0x40] sm:$0xff]  ;;  %v683_v11 = vld [vmem:[%s1022_s0 + $0x48] sm:$0xff]  ;;  %v677_v14 = vld [vmem:[%s1022_s0 + $0x18] sm:$0xff] }
   0x6   :  { %217 = vmatpush.bf16.msra.mxu0 %v696_v1  ;;  %707 = vmatpush.bf16.msra.mxu2 %v696_v1  ;;  %v685_v15 = vld [vmem:[%s1022_s0 + $0x58] sm:$0xff]  ;;  %v678_v16 = vld [vmem:[%s1022_s0 + $0x20] sm:$0xff]  ;;  %v679_v19 = vld [vmem:[%s1022_s0 + $0x28] sm:$0xff] }
   0x7   :  { %v686_v17 = vld [vmem:[%s1022_s0 + $0x60] sm:$0xff]  ;;  %v705_v18 = vld [vmem:[%s1023_s3 + $0x38] sm:$0xff]  ;;  %v687_v20 = vld [vmem:[%s1022_s0 + $0x68] sm:$0xff] }
   0x8   :  { %421 = vmatpush.bf16.msra.mxu1 %v705_v18  ;;  %714 = vmatpush.bf16.msra.mxu3 %v705_v18  ;;  %v704_v21 = vld [vmem:[%s1023_s3 + $0x30] sm:$0xff]  ;;  %v703_v22 = vld [vmem:[%s1023_s3 + $0x28] sm:$0xff]  ;;  %v702_v23 = vld [vmem:[%s1023_s3 + $0x20] sm:$0xff] }
   0x9   :  { %v701_v24 = vld [vmem:[%s1023_s3 + $0x18] sm:$0xff]  ;;  %v680_v25 = vld [vmem:[%s1022_s0 + $0x30] sm:$0xff]  ;;  %v699_v28 = vld [vmem:[%s1023_s3 + $0x8] sm:$0xff] }
   0xa   :  { %218 = vmatpush.bf16.msra.mxu0 %v695_v2  ;;  %708 = vmatpush.bf16.msra.mxu2 %v695_v2  ;;  %v688_v26 = vld [vmem:[%s1022_s0 + $0x70] sm:$0xff]  ;;  %v698_v29 = vld [vmem:[%s1023_s3] sm:$0xff]  ;;  %v681_v30 = vld [vmem:[%s1022_s0 + $0x38] sm:$0xff] }
   0xb   :  { %v700_v27 = vld [vmem:[%s1023_s3 + $0x10] sm:$0xff]  ;;  %v689_v31 = vld [vmem:[%s1022_s0 + $0x78] sm:$0xff]  ;;  %v853_v33 = vld [vmem:[%s1021_s2] ss:$0 sm:$0xff] }
   0xc   :  { %422 = vmatpush.bf16.msra.mxu1 %v704_v21  ;;  %715 = vmatpush.bf16.msra.mxu3 %v704_v21 }
   0xe   :  { %219 = vmatpush.bf16.msra.mxu0 %v694_v3  ;;  %709 = vmatpush.bf16.msra.mxu2 %v694_v3 }
  0x10   :  { %423 = vmatpush.bf16.msra.mxu1 %v703_v22  ;;  %716 = vmatpush.bf16.msra.mxu3 %v703_v22 }
  0x12   :  { %220 = vmatpush.bf16.msra.mxu0 %v693_v4  ;;  %710 = vmatpush.bf16.msra.mxu2 %v693_v4 }
  0x14   :  { %424 = vmatpush.bf16.msra.mxu1 %v702_v23  ;;  %717 = vmatpush.bf16.msra.mxu3 %v702_v23 }
  0x16   :  { %221 = vmatpush.bf16.msra.mxu0 %v692_v5  ;;  %711 = vmatpush.bf16.msra.mxu2 %v692_v5 }
  0x18   :  { %425 = vmatpush.bf16.msra.mxu1 %v701_v24  ;;  %718 = vmatpush.bf16.msra.mxu3 %v701_v24 }
  0x1a   :  { %222 = vmatpush.bf16.msra.mxu0 %v691_v6  ;;  %712 = vmatpush.bf16.msra.mxu2 %v691_v6 }
  0x1c   :  { %426 = vmatpush.bf16.msra.mxu1 %v700_v27  ;;  %719 = vmatpush.bf16.msra.mxu3 %v700_v27 }
  0x1e   :  { %223 = vmatpush.bf16.msra.mxu0 %v690_v7  ;;  %713 = vmatpush.bf16.msra.mxu2 %v690_v7 }
  0x20   :  { %427 = vmatpush.bf16.msra.mxu1 %v699_v28  ;;  %720 = vmatpush.bf16.msra.mxu3 %v699_v28 }
  0x21   :  { %224 = vmatmul.bf16.vlgmr.msra.gmra.mxu0 %v674_v8  ;;  %264 = vmatmul.bf16.vlgmr.msra.gmra.mxu2 %v682_v9 }
  0x24   :  { %428 = vmatpush.bf16.msra.mxu1 %v698_v29  ;;  %721 = vmatpush.bf16.msra.mxu3 %v698_v29 }
  0x31   :  { %229 = vmatmul.bf16.gmra.mxu0 %v675_v10  ;;  %269 = vmatmul.bf16.gmra.mxu2 %v683_v11 }
  0x41   :  { %234 = vmatmul.bf16.gmra.mxu0 %v676_v12  ;;  %274 = vmatmul.bf16.gmra.mxu2 %v684_v13 }
  0x51   :  { %239 = vmatmul.bf16.gmra.mxu0 %v677_v14  ;;  %279 = vmatmul.bf16.gmra.mxu2 %v685_v15 }
  0x61   :  { %244 = vmatmul.bf16.gmra.mxu0 %v678_v16  ;;  %284 = vmatmul.bf16.gmra.mxu2 %v686_v17 }
  0x71   :  { %249 = vmatmul.bf16.gmra.mxu0 %v679_v19  ;;  %289 = vmatmul.bf16.gmra.mxu2 %v687_v20 }
  0x81   :  { %254 = vmatmul.bf16.gmra.mxu0 %v680_v25  ;;  %294 = vmatmul.bf16.gmra.mxu2 %v688_v26 }
  0x91   :  { %259 = vmatmul.bf16.gmra.mxu0 %v681_v30  ;;  %299 = vmatmul.bf16.gmra.mxu2 %v689_v31 }
  0x9e   :  { %v225_v32 = vpop.f32.mrf.mxu0 }
  0x9f   :  { %v226_v34 = vadd.f32 %v853_v33, %v225_v32 }
  0xa1   :  { %v305_v37 = vmax.f32 %v226_v34, 0.0 }
  0xa4   :  { %v265_v35 = vpop.f32.mrf.mxu2 }
  0xa5   :  { %v266_v40 = vadd.f32 %v853_v33, %v265_v35 }
  0xa6   :  { %v227_v36 = vpop.f32.mrf.mxu0 }
  0xa7   :  { %v228_v38 = vadd.f32 %v853_v33, %v227_v36  ;;  %v321_v45 = vmax.f32 %v266_v40, 0.0 }
  0xa9   :  { %v306_v39 = vmax.f32 %v228_v38, 0.0 }
  0xab   :  { %v337_v41 = vpack.c.bf16 %v306_v39, %v305_v37 }
  0xac   :  { %v267_v42 = vpop.f32.mrf.mxu2 }
  0xad   :  { %v268_v43 = vadd.f32 %v853_v33, %v267_v42  ;;  %429 = vmatmul.bf16.vlgmr.msra.gmra.mxu1 %v337_v41 }
  0xae   :  { %v230_v44 = vpop.f32.mrf.mxu0 }
  0xaf   :  { %v322_v46 = vmax.f32 %v268_v43, 0.0  ;;  %v231_v48 = vadd.f32 %v853_v33, %v230_v44 }
  0xb1   :  { %v345_v47 = vpack.c.bf16 %v322_v46, %v321_v45  ;;  %v307_v51 = vmax.f32 %v231_v48, 0.0 }
  0xb3   :  { %469 = vmatmul.bf16.vlgmr.msra.gmra.mxu3 %v345_v47 }
  0xb4   :  { %v270_v49 = vpop.f32.mrf.mxu2 }
  0xb5   :  { %v271_v54 = vadd.f32 %v853_v33, %v270_v49 }
  0xb6   :  { %v232_v50 = vpop.f32.mrf.mxu0 }
  0xb7   :  { %v233_v52 = vadd.f32 %v853_v33, %v232_v50  ;;  %v323_v59 = vmax.f32 %v271_v54, 0.0 }
  0xb9   :  { %v308_v53 = vmax.f32 %v233_v52, 0.0 }
  0xbb   :  { %v338_v55 = vpack.c.bf16 %v308_v53, %v307_v51 }
  0xbc   :  { %v272_v56 = vpop.f32.mrf.mxu2 }
  0xbd   :  { %v273_v57 = vadd.f32 %v853_v33, %v272_v56  ;;  %434 = vmatmul.bf16.gmra.mxu1 %v338_v55 }
  0xbe   :  { %v235_v58 = vpop.f32.mrf.mxu0 }
  0xbf   :  { %v324_v60 = vmax.f32 %v273_v57, 0.0  ;;  %v236_v62 = vadd.f32 %v853_v33, %v235_v58 }
  0xc1   :  { %v346_v61 = vpack.c.bf16 %v324_v60, %v323_v59  ;;  %v309_v1 = vmax.f32 %v236_v62, 0.0 }
  0xc3   :  { %474 = vmatmul.bf16.gmra.mxu3 %v346_v61 }
  0xc4   :  { %v275_v63 = vpop.f32.mrf.mxu2 }
  0xc5   :  { %v276_v4 = vadd.f32 %v853_v33, %v275_v63 }
  0xc6   :  { %v237_v0 = vpop.f32.mrf.mxu0 }
  0xc7   :  { %v238_v2 = vadd.f32 %v853_v33, %v237_v0  ;;  %v325_v9 = vmax.f32 %v276_v4, 0.0 }
  0xc9   :  { %v310_v3 = vmax.f32 %v238_v2, 0.0 }
  0xcb   :  { %v339_v5 = vpack.c.bf16 %v310_v3, %v309_v1 }
  0xcc   :  { %v277_v6 = vpop.f32.mrf.mxu2 }
  0xcd   :  { %v278_v7 = vadd.f32 %v853_v33, %v277_v6  ;;  %439 = vmatmul.bf16.gmra.mxu1 %v339_v5 }
  0xce   :  { %v240_v8 = vpop.f32.mrf.mxu0 }
  0xcf   :  { %v326_v10 = vmax.f32 %v278_v7, 0.0  ;;  %v241_v12 = vadd.f32 %v853_v33, %v240_v8 }
  0xd1   :  { %v347_v11 = vpack.c.bf16 %v326_v10, %v325_v9  ;;  %v311_v15 = vmax.f32 %v241_v12, 0.0 }
  0xd3   :  { %479 = vmatmul.bf16.gmra.mxu3 %v347_v11 }
  0xd4   :  { %v280_v13 = vpop.f32.mrf.mxu2 }
  0xd5   :  { %v281_v18 = vadd.f32 %v853_v33, %v280_v13 }
  0xd6   :  { %v242_v14 = vpop.f32.mrf.mxu0 }
  0xd7   :  { %v243_v16 = vadd.f32 %v853_v33, %v242_v14  ;;  %v327_v23 = vmax.f32 %v281_v18, 0.0  ;;  %v890_v18 = vld [vmem:[%s1024_s4] ss:$0 sm:$0xff] }
  0xd9   :  { %v312_v17 = vmax.f32 %v243_v16, 0.0 }
  0xdb   :  { %v340_v19 = vpack.c.bf16 %v312_v17, %v311_v15 }
  0xdc   :  { %v282_v20 = vpop.f32.mrf.mxu2 }
  0xdd   :  { %v283_v21 = vadd.f32 %v853_v33, %v282_v20  ;;  %444 = vmatmul.bf16.gmra.mxu1 %v340_v19 }
  0xde   :  { %v245_v22 = vpop.f32.mrf.mxu0 }
  0xdf   :  { %v328_v24 = vmax.f32 %v283_v21, 0.0  ;;  %v246_v26 = vadd.f32 %v853_v33, %v245_v22 }
  0xe1   :  { %v348_v25 = vpack.c.bf16 %v328_v24, %v327_v23  ;;  %v313_v29 = vmax.f32 %v246_v26, 0.0 }
  0xe3   :  { %484 = vmatmul.bf16.gmra.mxu3 %v348_v25 }
  0xe4   :  { %v285_v27 = vpop.f32.mrf.mxu2 }
  0xe5   :  { %v286_v32 = vadd.f32 %v853_v33, %v285_v27 }
  0xe6   :  { %v247_v28 = vpop.f32.mrf.mxu0 }
  0xe7   :  { %v248_v30 = vadd.f32 %v853_v33, %v247_v28  ;;  %v329_v38 = vmax.f32 %v286_v32, 0.0 }
  0xe9   :  { %v314_v31 = vmax.f32 %v248_v30, 0.0 }
  0xeb   :  { %v341_v34 = vpack.c.bf16 %v314_v31, %v313_v29 }
  0xec   :  { %v287_v35 = vpop.f32.mrf.mxu2 }
  0xed   :  { %v288_v36 = vadd.f32 %v853_v33, %v287_v35  ;;  %449 = vmatmul.bf16.gmra.mxu1 %v341_v34 }
  0xee   :  { %v250_v37 = vpop.f32.mrf.mxu0 }
  0xef   :  { %v330_v39 = vmax.f32 %v288_v36, 0.0  ;;  %v251_v41 = vadd.f32 %v853_v33, %v250_v37 }
  0xf1   :  { %v349_v40 = vpack.c.bf16 %v330_v39, %v329_v38  ;;  %v315_v44 = vmax.f32 %v251_v41, 0.0 }
  0xf3   :  { %489 = vmatmul.bf16.gmra.mxu3 %v349_v40 }
  0xf4   :  { %v290_v42 = vpop.f32.mrf.mxu2 }
  0xf5   :  { %v291_v47 = vadd.f32 %v853_v33, %v290_v42 }
  0xf6   :  { %v252_v43 = vpop.f32.mrf.mxu0 }
  0xf7   :  { %v253_v45 = vadd.f32 %v853_v33, %v252_v43  ;;  %v331_v52 = vmax.f32 %v291_v47, 0.0 }
  0xf9   :  { %v316_v46 = vmax.f32 %v253_v45, 0.0 }
  0xfb   :  { %v342_v48 = vpack.c.bf16 %v316_v46, %v315_v44 }
  0xfc   :  { %v292_v49 = vpop.f32.mrf.mxu2 }
  0xfd   :  { %v293_v50 = vadd.f32 %v853_v33, %v292_v49  ;;  %454 = vmatmul.bf16.gmra.mxu1 %v342_v48 }
  0xfe   :  { %v255_v51 = vpop.f32.mrf.mxu0 }
  0xff   :  { %v332_v53 = vmax.f32 %v293_v50, 0.0  ;;  %v256_v55 = vadd.f32 %v853_v33, %v255_v51 }
 0x101   :  { %v350_v54 = vpack.c.bf16 %v332_v53, %v331_v52  ;;  %v317_v58 = vmax.f32 %v256_v55, 0.0 }
 0x103   :  { %494 = vmatmul.bf16.gmra.mxu3 %v350_v54 }
 0x104   :  { %v295_v56 = vpop.f32.mrf.mxu2 }
 0x105   :  { %v296_v61 = vadd.f32 %v853_v33, %v295_v56 }
 0x106   :  { %v257_v57 = vpop.f32.mrf.mxu0 }
 0x107   :  { %v258_v59 = vadd.f32 %v853_v33, %v257_v57  ;;  %v333_v2 = vmax.f32 %v296_v61, 0.0 }
 0x109   :  { %v318_v60 = vmax.f32 %v258_v59, 0.0 }
 0x10b   :  { %v343_v62 = vpack.c.bf16 %v318_v60, %v317_v58 }
 0x10c   :  { %v297_v63 = vpop.f32.mrf.mxu2 }
 0x10d   :  { %v298_v0 = vadd.f32 %v853_v33, %v297_v63  ;;  %459 = vmatmul.bf16.gmra.mxu1 %v343_v62 }
 0x10e   :  { %v260_v1 = vpop.f32.mrf.mxu0 }
 0x10f   :  { %v334_v3 = vmax.f32 %v298_v0, 0.0  ;;  %v261_v5 = vadd.f32 %v853_v33, %v260_v1 }
 0x111   :  { %v351_v4 = vpack.c.bf16 %v334_v3, %v333_v2  ;;  %v319_v8 = vmax.f32 %v261_v5, 0.0 }
 0x113   :  { %499 = vmatmul.bf16.gmra.mxu3 %v351_v4 }
 0x114   :  { %v300_v6 = vpop.f32.mrf.mxu2 }
 0x115   :  { %v301_v11 = vadd.f32 %v853_v33, %v300_v6 }
 0x116   :  { %v262_v7 = vpop.f32.mrf.mxu0 }
 0x117   :  { %v263_v9 = vadd.f32 %v853_v33, %v262_v7  ;;  %v335_v15 = vmax.f32 %v301_v11, 0.0 }
 0x119   :  { %v320_v10 = vmax.f32 %v263_v9, 0.0 }
 0x11b   :  { %v344_v12 = vpack.c.bf16 %v320_v10, %v319_v8 }
 0x11c   :  { %v302_v13 = vpop.f32.mrf.mxu2 }
 0x11d   :  { %v303_v14 = vadd.f32 %v853_v33, %v302_v13  ;;  %464 = vmatmul.bf16.gmra.mxu1 %v344_v12 }
 0x11f   :  { %v336_v16 = vmax.f32 %v303_v14, 0.0 }
 0x121   :  { %v352_v17 = vpack.c.bf16 %v336_v16, %v335_v15 }
 0x123   :  { %504 = vmatmul.bf16.gmra.mxu3 %v352_v17 }
 0x12a   :  { %v430_v19 = vpop.f32.mrf.mxu1 }
 0x12b   :  { %v431_v20 = vadd.f32 %v890_v18, %v430_v19 }
 0x12d   :  { %510 = vst [vmem:[%s1025_s5] sm:$0xff] %v431_v20 }
 0x132   :  { %v432_v21 = vpop.f32.mrf.mxu1 }
 0x133   :  { %v433_v33 = vadd.f32 %v890_v18, %v432_v21 }
 0x135   :  { %511 = vst [vmem:[%s1025_s5 + $0x8] sm:$0xff] %v433_v33 }
 0x136   :  { %v470_v22 = vpop.f32.mrf.mxu3 }
 0x137   :  { %v471_v23 = vadd.f32 %v890_v18, %v470_v22 }
 0x139   :  { %526 = vst [vmem:[%s1025_s5 + $0x80] sm:$0xff] %v471_v23 }
 0x13a   :  { %v435_v24 = vpop.f32.mrf.mxu1 }
 0x13b   :  { %v436_v25 = vadd.f32 %v890_v18, %v435_v24 }
 0x13d   :  { %512 = vst [vmem:[%s1025_s5 + $0x10] sm:$0xff] %v436_v25 }
 0x13e   :  { %v472_v26 = vpop.f32.mrf.mxu3 }
 0x13f   :  { %v473_v27 = vadd.f32 %v890_v18, %v472_v26 }
 0x141   :  { %527 = vst [vmem:[%s1025_s5 + $0x88] sm:$0xff] %v473_v27 }
 0x142   :  { %v437_v28 = vpop.f32.mrf.mxu1 }
 0x143   :  { %v438_v29 = vadd.f32 %v890_v18, %v437_v28 }
 0x145   :  { %513 = vst [vmem:[%s1025_s5 + $0x18] sm:$0xff] %v438_v29 }
 0x146   :  { %v475_v30 = vpop.f32.mrf.mxu3 }
 0x147   :  { %v476_v31 = vadd.f32 %v890_v18, %v475_v30 }
 0x149   :  { %528 = vst [vmem:[%s1025_s5 + $0x90] sm:$0xff] %v476_v31 }
 0x14a   :  { %v440_v32 = vpop.f32.mrf.mxu1 }
 0x14b   :  { %v441_v34 = vadd.f32 %v890_v18, %v440_v32 }
 0x14d   :  { %514 = vst [vmem:[%s1025_s5 + $0x20] sm:$0xff] %v441_v34 }
 0x14e   :  { %v477_v35 = vpop.f32.mrf.mxu3 }
 0x14f   :  { %v478_v36 = vadd.f32 %v890_v18, %v477_v35 }
 0x151   :  { %529 = vst [vmem:[%s1025_s5 + $0x98] sm:$0xff] %v478_v36 }
 0x152   :  { %v442_v37 = vpop.f32.mrf.mxu1 }
 0x153   :  { %v443_v38 = vadd.f32 %v890_v18, %v442_v37 }
 0x155   :  { %515 = vst [vmem:[%s1025_s5 + $0x28] sm:$0xff] %v443_v38 }
 0x156   :  { %v480_v39 = vpop.f32.mrf.mxu3 }
 0x157   :  { %v481_v40 = vadd.f32 %v890_v18, %v480_v39 }
 0x159   :  { %530 = vst [vmem:[%s1025_s5 + $0xa0] sm:$0xff] %v481_v40 }
 0x15a   :  { %v445_v41 = vpop.f32.mrf.mxu1 }
 0x15b   :  { %v446_v42 = vadd.f32 %v890_v18, %v445_v41 }
 0x15d   :  { %516 = vst [vmem:[%s1025_s5 + $0x30] sm:$0xff] %v446_v42 }
 0x15e   :  { %v482_v43 = vpop.f32.mrf.mxu3 }
 0x15f   :  { %v483_v44 = vadd.f32 %v890_v18, %v482_v43 }
 0x161   :  { %531 = vst [vmem:[%s1025_s5 + $0xa8] sm:$0xff] %v483_v44 }
 0x162   :  { %v447_v45 = vpop.f32.mrf.mxu1 }
 0x163   :  { %v448_v46 = vadd.f32 %v890_v18, %v447_v45 }
 0x165   :  { %517 = vst [vmem:[%s1025_s5 + $0x38] sm:$0xff] %v448_v46 }
 0x166   :  { %v485_v47 = vpop.f32.mrf.mxu3 }
 0x167   :  { %v486_v48 = vadd.f32 %v890_v18, %v485_v47 }
 0x169   :  { %532 = vst [vmem:[%s1025_s5 + $0xb0] sm:$0xff] %v486_v48 }
 0x16a   :  { %v450_v49 = vpop.f32.mrf.mxu1 }
 0x16b   :  { %v451_v50 = vadd.f32 %v890_v18, %v450_v49 }
 0x16d   :  { %518 = vst [vmem:[%s1025_s5 + $0x40] sm:$0xff] %v451_v50 }
 0x16e   :  { %v487_v51 = vpop.f32.mrf.mxu3 }
 0x16f   :  { %v488_v52 = vadd.f32 %v890_v18, %v487_v51 }
 0x171   :  { %533 = vst [vmem:[%s1025_s5 + $0xb8] sm:$0xff] %v488_v52 }
 0x172   :  { %v452_v53 = vpop.f32.mrf.mxu1 }
 0x173   :  { %v453_v54 = vadd.f32 %v890_v18, %v452_v53 }
 0x175   :  { %519 = vst [vmem:[%s1025_s5 + $0x48] sm:$0xff] %v453_v54 }
 0x176   :  { %v490_v55 = vpop.f32.mrf.mxu3 }
 0x177   :  { %v491_v56 = vadd.f32 %v890_v18, %v490_v55 }
 0x179   :  { %534 = vst [vmem:[%s1025_s5 + $0xc0] sm:$0xff] %v491_v56 }
 0x17a   :  { %v455_v57 = vpop.f32.mrf.mxu1 }
 0x17b   :  { %v456_v58 = vadd.f32 %v890_v18, %v455_v57 }
 0x17d   :  { %520 = vst [vmem:[%s1025_s5 + $0x50] sm:$0xff] %v456_v58 }
 0x17e   :  { %v492_v59 = vpop.f32.mrf.mxu3 }
 0x17f   :  { %v493_v60 = vadd.f32 %v890_v18, %v492_v59 }
 0x181   :  { %535 = vst [vmem:[%s1025_s5 + $0xc8] sm:$0xff] %v493_v60 }
 0x182   :  { %v457_v61 = vpop.f32.mrf.mxu1 }
 0x183   :  { %v458_v62 = vadd.f32 %v890_v18, %v457_v61 }
 0x185   :  { %521 = vst [vmem:[%s1025_s5 + $0x58] sm:$0xff] %v458_v62 }
 0x186   :  { %v495_v63 = vpop.f32.mrf.mxu3 }
 0x187   :  { %v496_v0 = vadd.f32 %v890_v18, %v495_v63 }
 0x189   :  { %536 = vst [vmem:[%s1025_s5 + $0xd0] sm:$0xff] %v496_v0 }
 0x18a   :  { %v460_v1 = vpop.f32.mrf.mxu1 }
 0x18b   :  { %v461_v2 = vadd.f32 %v890_v18, %v460_v1 }
 0x18d   :  { %522 = vst [vmem:[%s1025_s5 + $0x60] sm:$0xff] %v461_v2 }
 0x18e   :  { %v497_v3 = vpop.f32.mrf.mxu3 }
 0x18f   :  { %v498_v4 = vadd.f32 %v890_v18, %v497_v3 }
 0x191   :  { %537 = vst [vmem:[%s1025_s5 + $0xd8] sm:$0xff] %v498_v4 }
 0x192   :  { %v462_v5 = vpop.f32.mrf.mxu1 }
 0x193   :  { %v463_v6 = vadd.f32 %v890_v18, %v462_v5 }
 0x195   :  { %523 = vst [vmem:[%s1025_s5 + $0x68] sm:$0xff] %v463_v6 }
 0x196   :  { %v500_v7 = vpop.f32.mrf.mxu3 }
 0x197   :  { %v501_v8 = vadd.f32 %v890_v18, %v500_v7 }
 0x199   :  { %538 = vst [vmem:[%s1025_s5 + $0xe0] sm:$0xff] %v501_v8 }
 0x19a   :  { %v465_v9 = vpop.f32.mrf.mxu1 }
 0x19b   :  { %v466_v10 = vadd.f32 %v890_v18, %v465_v9 }
 0x19d   :  { %524 = vst [vmem:[%s1025_s5 + $0x70] sm:$0xff] %v466_v10 }
 0x19e   :  { %v502_v11 = vpop.f32.mrf.mxu3 }
 0x19f   :  { %v503_v12 = vadd.f32 %v890_v18, %v502_v11 }
 0x1a1   :  { %539 = vst [vmem:[%s1025_s5 + $0xe8] sm:$0xff] %v503_v12 }
 0x1a2   :  { %v467_v13 = vpop.f32.mrf.mxu1 }
 0x1a3   :  { %v468_v14 = vadd.f32 %v890_v18, %v467_v13 }
 0x1a5   :  { %525 = vst [vmem:[%s1025_s5 + $0x78] sm:$0xff] %v468_v14 }
 0x1a6   :  { %v505_v15 = vpop.f32.mrf.mxu3 }
 0x1a7   :  { %v506_v16 = vadd.f32 %v890_v18, %v505_v15 }
 0x1a9   :  { %540 = vst [vmem:[%s1025_s5 + $0xf0] sm:$0xff] %v506_v16 }
 0x1ae   :  { %v507_v17 = vpop.f32.mrf.mxu3 }
 0x1af   :  { %v508_v19 = vadd.f32 %v890_v18, %v507_v17 }
 0x1b1   :  { %541 = vst [vmem:[%s1025_s5 + $0xf8] sm:$0xff] %v508_v19 }

// kernel: gcn_forward.6
= control target key start
LH: loop header
LB: loop body
LE: loop exit
PB: predicated region body
PF: predicated region fallthrough
CT: control target
= control target key end

     0   :  { %s1512_s1 = inlined_call_operand.vmem [shape: bf16[256,128], index: 1, kind: input, shape index: {}]   ;;  %s1513_s0 = inlined_call_operand.vmem [shape: bf16[256,256], index: 0, kind: input, shape index: {}]   ;;  %s1514_s2 = inlined_call_operand.vmem [shape: f32[1,128], index: 2, kind: input, shape index: {}]   ;;  %s1515_s3 = inlined_call_operand.vmem [shape: bf16[256,128], index: 3, kind: output, shape index: {}]  }
   0x1   :  { %v1046_v0 = vld [vmem:[%s1512_s1 + $0x38] sm:$0xff]  ;;  %v1045_v2 = vld [vmem:[%s1512_s1 + $0x30] sm:$0xff]  ;;  %v1044_v4 = vld [vmem:[%s1512_s1 + $0x28] sm:$0xff] }
   0x2   :  { %v1054_v1 = vld [vmem:[%s1512_s1 + $0x78] sm:$0xff]  ;;  %402 = vmatpush.bf16.msra.mxu0 %v1046_v0  ;;  %1150 = vmatpush.bf16.msra.mxu2 %v1046_v0  ;;  %v1053_v3 = vld [vmem:[%s1512_s1 + $0x70] sm:$0xff]  ;;  %v1052_v5 = vld [vmem:[%s1512_s1 + $0x68] sm:$0xff] }
   0x3   :  { %491 = vmatpush.bf16.msra.mxu1 %v1054_v1  ;;  %1158 = vmatpush.bf16.msra.mxu3 %v1054_v1  ;;  %v1043_v6 = vld [vmem:[%s1512_s1 + $0x20] sm:$0xff]  ;;  %v1042_v8 = vld [vmem:[%s1512_s1 + $0x18] sm:$0xff]  ;;  %v1041_v10 = vld [vmem:[%s1512_s1 + $0x10] sm:$0xff] }
   0x4   :  { %v1051_v7 = vld [vmem:[%s1512_s1 + $0x60] sm:$0xff]  ;;  %v1050_v9 = vld [vmem:[%s1512_s1 + $0x58] sm:$0xff]  ;;  %v1049_v11 = vld [vmem:[%s1512_s1 + $0x50] sm:$0xff] }
   0x5   :  { %v1040_v12 = vld [vmem:[%s1512_s1 + $0x8] sm:$0xff]  ;;  %v1039_v14 = vld [vmem:[%s1512_s1] sm:$0xff]  ;;  %v825_v28 = vld [vmem:[%s1513_s0 + $0x10] sm:$0xf] }
   0x6   :  { %403 = vmatpush.bf16.msra.mxu0 %v1045_v2  ;;  %1151 = vmatpush.bf16.msra.mxu2 %v1045_v2  ;;  %v1048_v13 = vld [vmem:[%s1512_s1 + $0x48] sm:$0xff]  ;;  %v1047_v15 = vld [vmem:[%s1512_s1 + $0x40] sm:$0xff]  ;;  %v1010_v29 = vld [vmem:[%s1513_s0 + $0x14] sm:$0xf0] }
   0x7   :  { %492 = vmatpush.bf16.msra.mxu1 %v1053_v3  ;;  %1159 = vmatpush.bf16.msra.mxu3 %v1053_v3  ;;  %v817_v16 = vld [vmem:[%s1513_s0] sm:$0xf]  ;;  %v1008_v17 = vld [vmem:[%s1513_s0 + $0x4] sm:$0xf0]  ;;  %v1007_v20 = vld [vmem:[%s1513_s0 + $0x4] sm:$0xf]  ;;  %v826_v36 = vor.u32 %v1010_v29, %v825_v28 }
   0x8   :  { %v881_v18 = vld [vmem:[%s1513_s0 + $0x80] sm:$0xf]  ;;  %v1024_v19 = vld [vmem:[%s1513_s0 + $0x84] sm:$0xf0]  ;;  %v819_v21 = vld [vmem:[%s1513_s0 + $0x8] sm:$0xf0]  ;;  %v818_v24 = vor.u32 %v1008_v17, %v817_v16 }
   0x9   :  { %v1023_v22 = vld [vmem:[%s1513_s0 + $0x84] sm:$0xf]  ;;  %v883_v23 = vld [vmem:[%s1513_s0 + $0x88] sm:$0xf0]  ;;  %v882_v25 = vor.u32 %v1024_v19, %v881_v18  ;;  %v822_v26 = vor.u32 %v1007_v20, %v819_v21  ;;  %v889_v30 = vld [vmem:[%s1513_s0 + $0x90] sm:$0xf] }
   0xa   :  { %404 = vmatpush.bf16.msra.mxu0 %v1044_v4  ;;  %1152 = vmatpush.bf16.msra.mxu2 %v1044_v4  ;;  %v886_v27 = vor.u32 %v1023_v22, %v883_v23  ;;  %v1026_v31 = vld [vmem:[%s1513_s0 + $0x94] sm:$0xf0]  ;;  %v1009_v32 = vld [vmem:[%s1513_s0 + $0x14] sm:$0xf]  ;;  %v827_v33 = vld [vmem:[%s1513_s0 + $0x18] sm:$0xf0] }
   0xb   :  { %493 = vmatpush.bf16.msra.mxu1 %v1052_v5  ;;  %1160 = vmatpush.bf16.msra.mxu3 %v1052_v5  ;;  %v1025_v34 = vld [vmem:[%s1513_s0 + $0x94] sm:$0xf]  ;;  %v891_v35 = vld [vmem:[%s1513_s0 + $0x98] sm:$0xf0]  ;;  %v890_v37 = vor.u32 %v1026_v31, %v889_v30  ;;  %v830_v38 = vor.u32 %v1009_v32, %v827_v33  ;;  %v833_v40 = vld [vmem:[%s1513_s0 + $0x20] sm:$0xf] }
   0xc   :  { %v894_v39 = vor.u32 %v1025_v34, %v891_v35  ;;  %v1012_v41 = vld [vmem:[%s1513_s0 + $0x24] sm:$0xf0]  ;;  %v897_v42 = vld [vmem:[%s1513_s0 + $0xa0] sm:$0xf]  ;;  %v1011_v44 = vld [vmem:[%s1513_s0 + $0x24] sm:$0xf] }
   0xd   :  { %v1028_v43 = vld [vmem:[%s1513_s0 + $0xa4] sm:$0xf0]  ;;  %v835_v45 = vld [vmem:[%s1513_s0 + $0x28] sm:$0xf0]  ;;  %v1027_v46 = vld [vmem:[%s1513_s0 + $0xa4] sm:$0xf]  ;;  %v834_v48 = vor.u32 %v1012_v41, %v833_v40 }
   0xe   :  { %405 = vmatpush.bf16.msra.mxu0 %v1043_v6  ;;  %1153 = vmatpush.bf16.msra.mxu2 %v1043_v6  ;;  %v899_v47 = vld [vmem:[%s1513_s0 + $0xa8] sm:$0xf0]  ;;  %v898_v49 = vor.u32 %v1028_v43, %v897_v42  ;;  %v838_v50 = vor.u32 %v1011_v44, %v835_v45  ;;  %v841_v52 = vld [vmem:[%s1513_s0 + $0x30] sm:$0xf]  ;;  %v1014_v53 = vld [vmem:[%s1513_s0 + $0x34] sm:$0xf0] }
   0xf   :  { %494 = vmatpush.bf16.msra.mxu1 %v1051_v7  ;;  %1161 = vmatpush.bf16.msra.mxu3 %v1051_v7  ;;  %v902_v51 = vor.u32 %v1027_v46, %v899_v47  ;;  %v905_v54 = vld [vmem:[%s1513_s0 + $0xb0] sm:$0xf]  ;;  %v1030_v55 = vld [vmem:[%s1513_s0 + $0xb4] sm:$0xf0]  ;;  %v1013_v56 = vld [vmem:[%s1513_s0 + $0x34] sm:$0xf]  ;;  %v842_v60 = vor.u32 %v1014_v53, %v841_v52 }
  0x10   :  { %v843_v57 = vld [vmem:[%s1513_s0 + $0x38] sm:$0xf0]  ;;  %v1029_v58 = vld [vmem:[%s1513_s0 + $0xb4] sm:$0xf]  ;;  %v906_v61 = vor.u32 %v1030_v55, %v905_v54  ;;  %v849_v0 = vld [vmem:[%s1513_s0 + $0x40] sm:$0xf] }
  0x11   :  { %v907_v59 = vld [vmem:[%s1513_s0 + $0xb8] sm:$0xf0]  ;;  %v846_v62 = vor.u32 %v1013_v56, %v843_v57  ;;  %v1016_v1 = vld [vmem:[%s1513_s0 + $0x44] sm:$0xf0]  ;;  %v913_v2 = vld [vmem:[%s1513_s0 + $0xc0] sm:$0xf] }
  0x12   :  { %406 = vmatpush.bf16.msra.mxu0 %v1042_v8  ;;  %1154 = vmatpush.bf16.msra.mxu2 %v1042_v8  ;;  %v910_v63 = vor.u32 %v1029_v58, %v907_v59  ;;  %v1032_v3 = vld [vmem:[%s1513_s0 + $0xc4] sm:$0xf0]  ;;  %v1015_v4 = vld [vmem:[%s1513_s0 + $0x44] sm:$0xf]  ;;  %v851_v5 = vld [vmem:[%s1513_s0 + $0x48] sm:$0xf0]  ;;  %v850_v8 = vor.u32 %v1016_v1, %v849_v0 }
  0x13   :  { %495 = vmatpush.bf16.msra.mxu1 %v1050_v9  ;;  %1162 = vmatpush.bf16.msra.mxu3 %v1050_v9  ;;  %v1031_v6 = vld [vmem:[%s1513_s0 + $0xc4] sm:$0xf]  ;;  %v915_v7 = vld [vmem:[%s1513_s0 + $0xc8] sm:$0xf0]  ;;  %v914_v9 = vor.u32 %v1032_v3, %v913_v2  ;;  %v1017_v16 = vld [vmem:[%s1513_s0 + $0x54] sm:$0xf] }
  0x14   :  { %v859_v17 = vld [vmem:[%s1513_s0 + $0x58] sm:$0xf0]  ;;  %v1033_v18 = vld [vmem:[%s1513_s0 + $0xd4] sm:$0xf]  ;;  %v1019_v28 = vld [vmem:[%s1513_s0 + $0x64] sm:$0xf] }
  0x15   :  { %v923_v19 = vld [vmem:[%s1513_s0 + $0xd8] sm:$0xf0]  ;;  %v862_v22 = vor.u32 %v1017_v16, %v859_v17  ;;  %v867_v29 = vld [vmem:[%s1513_s0 + $0x68] sm:$0xf0]  ;;  %v1035_v30 = vld [vmem:[%s1513_s0 + $0xe4] sm:$0xf] }
  0x16   :  { %407 = vmatpush.bf16.msra.mxu0 %v1041_v10  ;;  %1155 = vmatpush.bf16.msra.mxu2 %v1041_v10  ;;  %v854_v10 = vor.u32 %v1015_v4, %v851_v5  ;;  %v926_v23 = vor.u32 %v1033_v18, %v923_v19  ;;  %v931_v31 = vld [vmem:[%s1513_s0 + $0xe8] sm:$0xf0]  ;;  %v870_v34 = vor.u32 %v1019_v28, %v867_v29  ;;  %v1021_v40 = vld [vmem:[%s1513_s0 + $0x74] sm:$0xf]  ;;  %v875_v41 = vld [vmem:[%s1513_s0 + $0x78] sm:$0xf0] }
  0x17   :  { %496 = vmatpush.bf16.msra.mxu1 %v1049_v11  ;;  %1163 = vmatpush.bf16.msra.mxu3 %v1049_v11  ;;  %v918_v11 = vor.u32 %v1031_v6, %v915_v7  ;;  %v934_v35 = vor.u32 %v1035_v30, %v931_v31  ;;  %v1037_v42 = vld [vmem:[%s1513_s0 + $0xf4] sm:$0xf]  ;;  %v939_v43 = vld [vmem:[%s1513_s0 + $0xf8] sm:$0xf0]  ;;  %v878_v46 = vor.u32 %v1021_v40, %v875_v41 }
  0x18   :  { %v942_v47 = vor.u32 %v1037_v42, %v939_v43 }
  0x1a   :  { %408 = vmatpush.bf16.msra.mxu0 %v1040_v12  ;;  %1156 = vmatpush.bf16.msra.mxu2 %v1040_v12  ;;  %v857_v12 = vld [vmem:[%s1513_s0 + $0x50] sm:$0xf] }
  0x1b   :  { %497 = vmatpush.bf16.msra.mxu1 %v1048_v13  ;;  %1164 = vmatpush.bf16.msra.mxu3 %v1048_v13  ;;  %v1018_v13 = vld [vmem:[%s1513_s0 + $0x54] sm:$0xf0] }
  0x1c   :  { %v858_v20 = vor.u32 %v1018_v13, %v857_v12 }
  0x1e   :  { %409 = vmatpush.bf16.msra.mxu0 %v1039_v14  ;;  %1157 = vmatpush.bf16.msra.mxu2 %v1039_v14  ;;  %v921_v14 = vld [vmem:[%s1513_s0 + $0xd0] sm:$0xf] }
  0x1f   :  { %498 = vmatpush.bf16.msra.mxu1 %v1047_v15  ;;  %1165 = vmatpush.bf16.msra.mxu3 %v1047_v15  ;;  %v1034_v15 = vld [vmem:[%s1513_s0 + $0xd4] sm:$0xf0] }
  0x20   :  { %v922_v21 = vor.u32 %v1034_v15, %v921_v14 }
  0x21   :  { %410 = vmatmul.bf16.vlgmr.msra.gmra.mxu0 %v818_v24  ;;  %450 = vmatmul.bf16.vlgmr.msra.gmra.mxu2 %v882_v25  ;;  %v865_v24 = vld [vmem:[%s1513_s0 + $0x60] sm:$0xf]  ;;  %v1020_v25 = vld [vmem:[%s1513_s0 + $0x64] sm:$0xf0] }
  0x22   :  { %499 = vmatmul.bf16.vlgmr.msra.gmra.mxu1 %v822_v26  ;;  %539 = vmatmul.bf16.vlgmr.msra.gmra.mxu3 %v886_v27  ;;  %v929_v26 = vld [vmem:[%s1513_s0 + $0xe0] sm:$0xf]  ;;  %v1036_v27 = vld [vmem:[%s1513_s0 + $0xe4] sm:$0xf0]  ;;  %v866_v32 = vor.u32 %v1020_v25, %v865_v24 }
  0x23   :  { %v930_v33 = vor.u32 %v1036_v27, %v929_v26 }
  0x31   :  { %415 = vmatmul.bf16.gmra.mxu0 %v826_v36  ;;  %455 = vmatmul.bf16.gmra.mxu2 %v890_v37  ;;  %v873_v36 = vld [vmem:[%s1513_s0 + $0x70] sm:$0xf]  ;;  %v1022_v37 = vld [vmem:[%s1513_s0 + $0x74] sm:$0xf0] }
  0x32   :  { %504 = vmatmul.bf16.gmra.mxu1 %v830_v38  ;;  %544 = vmatmul.bf16.gmra.mxu3 %v894_v39  ;;  %v937_v38 = vld [vmem:[%s1513_s0 + $0xf0] sm:$0xf]  ;;  %v1038_v39 = vld [vmem:[%s1513_s0 + $0xf4] sm:$0xf0]  ;;  %v874_v44 = vor.u32 %v1022_v37, %v873_v36 }
  0x33   :  { %v938_v45 = vor.u32 %v1038_v39, %v937_v38 }
  0x41   :  { %420 = vmatmul.bf16.gmra.mxu0 %v834_v48  ;;  %460 = vmatmul.bf16.gmra.mxu2 %v898_v49 }
  0x42   :  { %509 = vmatmul.bf16.gmra.mxu1 %v838_v50  ;;  %549 = vmatmul.bf16.gmra.mxu3 %v902_v51  ;;  %v1430_v51 = vld [vmem:[%s1514_s2] ss:$0 sm:$0xff] }
  0x51   :  { %425 = vmatmul.bf16.gmra.mxu0 %v842_v60  ;;  %465 = vmatmul.bf16.gmra.mxu2 %v906_v61 }
  0x52   :  { %514 = vmatmul.bf16.gmra.mxu1 %v846_v62  ;;  %554 = vmatmul.bf16.gmra.mxu3 %v910_v63 }
  0x61   :  { %430 = vmatmul.bf16.gmra.mxu0 %v850_v8  ;;  %470 = vmatmul.bf16.gmra.mxu2 %v914_v9 }
  0x62   :  { %519 = vmatmul.bf16.gmra.mxu1 %v854_v10  ;;  %559 = vmatmul.bf16.gmra.mxu3 %v918_v11 }
  0x71   :  { %435 = vmatmul.bf16.gmra.mxu0 %v858_v20  ;;  %475 = vmatmul.bf16.gmra.mxu2 %v922_v21 }
  0x72   :  { %524 = vmatmul.bf16.gmra.mxu1 %v862_v22  ;;  %564 = vmatmul.bf16.gmra.mxu3 %v926_v23 }
  0x81   :  { %440 = vmatmul.bf16.gmra.mxu0 %v866_v32  ;;  %480 = vmatmul.bf16.gmra.mxu2 %v930_v33 }
  0x82   :  { %529 = vmatmul.bf16.gmra.mxu1 %v870_v34  ;;  %569 = vmatmul.bf16.gmra.mxu3 %v934_v35 }
  0x91   :  { %445 = vmatmul.bf16.gmra.mxu0 %v874_v44  ;;  %485 = vmatmul.bf16.gmra.mxu2 %v938_v45 }
  0x92   :  { %534 = vmatmul.bf16.gmra.mxu1 %v878_v46  ;;  %574 = vmatmul.bf16.gmra.mxu3 %v942_v47 }
  0x9e   :  { %v411_v48 = vpop.f32.mrf.mxu0 }
  0x9f   :  { %v500_v49 = vpop.f32.mrf.mxu1 }
  0xa0   :  { %v501_v50 = vadd.f32 %v500_v49, %v411_v48 }
  0xa2   :  { %v683_v56 = vadd.f32 %v1430_v51, %v501_v50 }
  0xa4   :  { %v451_v52 = vpop.f32.mrf.mxu2  ;;  %v715_v60 = vmax.f32 %v683_v56, 0.0 }
  0xa5   :  { %v540_v53 = vpop.f32.mrf.mxu3 }
  0xa6   :  { %v413_v54 = vpop.f32.mrf.mxu0  ;;  %v541_v58 = vadd.f32 %v540_v53, %v451_v52 }
  0xa7   :  { %v502_v55 = vpop.f32.mrf.mxu1 }
  0xa8   :  { %v503_v57 = vadd.f32 %v502_v55, %v413_v54  ;;  %v699_v0 = vadd.f32 %v1430_v51, %v541_v58 }
  0xaa   :  { %v684_v59 = vadd.f32 %v1430_v51, %v503_v57  ;;  %v731_v6 = vmax.f32 %v699_v0, 0.0 }
  0xac   :  { %v716_v61 = vmax.f32 %v684_v59, 0.0  ;;  %v453_v62 = vpop.f32.mrf.mxu2 }
  0xad   :  { %v542_v63 = vpop.f32.mrf.mxu3 }
  0xae   :  { %v1058_v1 = vpack.c.bf16 %v716_v61, %v715_v60  ;;  %v543_v2 = vadd.f32 %v542_v63, %v453_v62  ;;  %v416_v3 = vpop.f32.mrf.mxu0 }
  0xaf   :  { %v505_v4 = vpop.f32.mrf.mxu1 }
  0xb0   :  { %1059 = vst [vmem:[%s1515_s3] sm:$0xff] %v1058_v1   ;;  %v700_v5 = vadd.f32 %v1430_v51, %v543_v2  ;;  %v506_v9 = vadd.f32 %v505_v4, %v416_v3 }
  0xb2   :  { %v732_v7 = vmax.f32 %v700_v5, 0.0  ;;  %v685_v14 = vadd.f32 %v1430_v51, %v506_v9 }
  0xb4   :  { %v1098_v8 = vpack.c.bf16 %v732_v7, %v731_v6  ;;  %v456_v10 = vpop.f32.mrf.mxu2  ;;  %v717_v18 = vmax.f32 %v685_v14, 0.0 }
  0xb5   :  { %v545_v11 = vpop.f32.mrf.mxu3 }
  0xb6   :  { %1142 = vst [vmem:[%s1515_s3 + $0x40] sm:$0xff] %v1098_v8   ;;  %v418_v12 = vpop.f32.mrf.mxu0  ;;  %v546_v16 = vadd.f32 %v545_v11, %v456_v10 }
  0xb7   :  { %v507_v13 = vpop.f32.mrf.mxu1 }
  0xb8   :  { %v508_v15 = vadd.f32 %v507_v13, %v418_v12  ;;  %v701_v22 = vadd.f32 %v1430_v51, %v546_v16 }
  0xba   :  { %v686_v17 = vadd.f32 %v1430_v51, %v508_v15  ;;  %v733_v28 = vmax.f32 %v701_v22, 0.0 }
  0xbc   :  { %v718_v19 = vmax.f32 %v686_v17, 0.0  ;;  %v458_v20 = vpop.f32.mrf.mxu2 }
  0xbd   :  { %v547_v21 = vpop.f32.mrf.mxu3 }
  0xbe   :  { %v1063_v23 = vpack.c.bf16 %v718_v19, %v717_v18  ;;  %v548_v24 = vadd.f32 %v547_v21, %v458_v20  ;;  %v421_v25 = vpop.f32.mrf.mxu0 }
  0xbf   :  { %v510_v26 = vpop.f32.mrf.mxu1 }
  0xc0   :  { %1135 = vst [vmem:[%s1515_s3 + $0x8] sm:$0xff] %v1063_v23   ;;  %v702_v27 = vadd.f32 %v1430_v51, %v548_v24  ;;  %v511_v31 = vadd.f32 %v510_v26, %v421_v25 }
  0xc2   :  { %v734_v29 = vmax.f32 %v702_v27, 0.0  ;;  %v687_v36 = vadd.f32 %v1430_v51, %v511_v31 }
  0xc4   :  { %v1103_v30 = vpack.c.bf16 %v734_v29, %v733_v28  ;;  %v461_v32 = vpop.f32.mrf.mxu2  ;;  %v719_v40 = vmax.f32 %v687_v36, 0.0 }
  0xc5   :  { %v550_v33 = vpop.f32.mrf.mxu3 }
  0xc6   :  { %1143 = vst [vmem:[%s1515_s3 + $0x48] sm:$0xff] %v1103_v30   ;;  %v423_v34 = vpop.f32.mrf.mxu0  ;;  %v551_v38 = vadd.f32 %v550_v33, %v461_v32 }
  0xc7   :  { %v512_v35 = vpop.f32.mrf.mxu1 }
  0xc8   :  { %v513_v37 = vadd.f32 %v512_v35, %v423_v34  ;;  %v703_v44 = vadd.f32 %v1430_v51, %v551_v38 }
  0xca   :  { %v688_v39 = vadd.f32 %v1430_v51, %v513_v37  ;;  %v735_v50 = vmax.f32 %v703_v44, 0.0 }
  0xcc   :  { %v720_v41 = vmax.f32 %v688_v39, 0.0  ;;  %v463_v42 = vpop.f32.mrf.mxu2 }
  0xcd   :  { %v552_v43 = vpop.f32.mrf.mxu3 }
  0xce   :  { %v1068_v45 = vpack.c.bf16 %v720_v41, %v719_v40  ;;  %v553_v46 = vadd.f32 %v552_v43, %v463_v42  ;;  %v426_v47 = vpop.f32.mrf.mxu0 }
  0xcf   :  { %v515_v48 = vpop.f32.mrf.mxu1 }
  0xd0   :  { %1136 = vst [vmem:[%s1515_s3 + $0x10] sm:$0xff] %v1068_v45   ;;  %v704_v49 = vadd.f32 %v1430_v51, %v553_v46  ;;  %v516_v54 = vadd.f32 %v515_v48, %v426_v47 }
  0xd2   :  { %v736_v52 = vmax.f32 %v704_v49, 0.0  ;;  %v689_v59 = vadd.f32 %v1430_v51, %v516_v54 }
  0xd4   :  { %v1108_v53 = vpack.c.bf16 %v736_v52, %v735_v50  ;;  %v466_v55 = vpop.f32.mrf.mxu2  ;;  %v721_v63 = vmax.f32 %v689_v59, 0.0 }
  0xd5   :  { %v555_v56 = vpop.f32.mrf.mxu3 }
  0xd6   :  { %1144 = vst [vmem:[%s1515_s3 + $0x50] sm:$0xff] %v1108_v53   ;;  %v428_v57 = vpop.f32.mrf.mxu0  ;;  %v556_v61 = vadd.f32 %v555_v56, %v466_v55 }
  0xd7   :  { %v517_v58 = vpop.f32.mrf.mxu1 }
  0xd8   :  { %v518_v60 = vadd.f32 %v517_v58, %v428_v57  ;;  %v705_v3 = vadd.f32 %v1430_v51, %v556_v61 }
  0xda   :  { %v690_v62 = vadd.f32 %v1430_v51, %v518_v60  ;;  %v737_v9 = vmax.f32 %v705_v3, 0.0 }
  0xdc   :  { %v722_v0 = vmax.f32 %v690_v62, 0.0  ;;  %v468_v1 = vpop.f32.mrf.mxu2 }
  0xdd   :  { %v557_v2 = vpop.f32.mrf.mxu3 }
  0xde   :  { %v1073_v4 = vpack.c.bf16 %v722_v0, %v721_v63  ;;  %v558_v5 = vadd.f32 %v557_v2, %v468_v1  ;;  %v431_v6 = vpop.f32.mrf.mxu0 }
  0xdf   :  { %v520_v7 = vpop.f32.mrf.mxu1 }
  0xe0   :  { %1137 = vst [vmem:[%s1515_s3 + $0x18] sm:$0xff] %v1073_v4   ;;  %v706_v8 = vadd.f32 %v1430_v51, %v558_v5  ;;  %v521_v12 = vadd.f32 %v520_v7, %v431_v6 }
  0xe2   :  { %v738_v10 = vmax.f32 %v706_v8, 0.0  ;;  %v691_v17 = vadd.f32 %v1430_v51, %v521_v12 }
  0xe4   :  { %v1113_v11 = vpack.c.bf16 %v738_v10, %v737_v9  ;;  %v471_v13 = vpop.f32.mrf.mxu2  ;;  %v723_v21 = vmax.f32 %v691_v17, 0.0 }
  0xe5   :  { %v560_v14 = vpop.f32.mrf.mxu3 }
  0xe6   :  { %1145 = vst [vmem:[%s1515_s3 + $0x58] sm:$0xff] %v1113_v11   ;;  %v433_v15 = vpop.f32.mrf.mxu0  ;;  %v561_v19 = vadd.f32 %v560_v14, %v471_v13 }
  0xe7   :  { %v522_v16 = vpop.f32.mrf.mxu1 }
  0xe8   :  { %v523_v18 = vadd.f32 %v522_v16, %v433_v15  ;;  %v707_v25 = vadd.f32 %v1430_v51, %v561_v19 }
  0xea   :  { %v692_v20 = vadd.f32 %v1430_v51, %v523_v18  ;;  %v739_v31 = vmax.f32 %v707_v25, 0.0 }
  0xec   :  { %v724_v22 = vmax.f32 %v692_v20, 0.0  ;;  %v473_v23 = vpop.f32.mrf.mxu2 }
  0xed   :  { %v562_v24 = vpop.f32.mrf.mxu3 }
  0xee   :  { %v1078_v26 = vpack.c.bf16 %v724_v22, %v723_v21  ;;  %v563_v27 = vadd.f32 %v562_v24, %v473_v23  ;;  %v436_v28 = vpop.f32.mrf.mxu0 }
  0xef   :  { %v525_v29 = vpop.f32.mrf.mxu1 }
  0xf0   :  { %1138 = vst [vmem:[%s1515_s3 + $0x20] sm:$0xff] %v1078_v26   ;;  %v708_v30 = vadd.f32 %v1430_v51, %v563_v27  ;;  %v526_v34 = vadd.f32 %v525_v29, %v436_v28 }
  0xf2   :  { %v740_v32 = vmax.f32 %v708_v30, 0.0  ;;  %v693_v39 = vadd.f32 %v1430_v51, %v526_v34 }
  0xf4   :  { %v1118_v33 = vpack.c.bf16 %v740_v32, %v739_v31  ;;  %v476_v35 = vpop.f32.mrf.mxu2  ;;  %v725_v43 = vmax.f32 %v693_v39, 0.0 }
  0xf5   :  { %v565_v36 = vpop.f32.mrf.mxu3 }
  0xf6   :  { %1146 = vst [vmem:[%s1515_s3 + $0x60] sm:$0xff] %v1118_v33   ;;  %v438_v37 = vpop.f32.mrf.mxu0  ;;  %v566_v41 = vadd.f32 %v565_v36, %v476_v35 }
  0xf7   :  { %v527_v38 = vpop.f32.mrf.mxu1 }
  0xf8   :  { %v528_v40 = vadd.f32 %v527_v38, %v438_v37  ;;  %v709_v47 = vadd.f32 %v1430_v51, %v566_v41 }
  0xfa   :  { %v694_v42 = vadd.f32 %v1430_v51, %v528_v40  ;;  %v741_v54 = vmax.f32 %v709_v47, 0.0 }
  0xfc   :  { %v726_v44 = vmax.f32 %v694_v42, 0.0  ;;  %v478_v45 = vpop.f32.mrf.mxu2 }
  0xfd   :  { %v567_v46 = vpop.f32.mrf.mxu3 }
  0xfe   :  { %v1083_v48 = vpack.c.bf16 %v726_v44, %v725_v43  ;;  %v568_v49 = vadd.f32 %v567_v46, %v478_v45  ;;  %v441_v50 = vpop.f32.mrf.mxu0 }
  0xff   :  { %v530_v52 = vpop.f32.mrf.mxu1 }
 0x100   :  { %1139 = vst [vmem:[%s1515_s3 + $0x28] sm:$0xff] %v1083_v48   ;;  %v710_v53 = vadd.f32 %v1430_v51, %v568_v49  ;;  %v531_v57 = vadd.f32 %v530_v52, %v441_v50 }
 0x102   :  { %v742_v55 = vmax.f32 %v710_v53, 0.0  ;;  %v695_v62 = vadd.f32 %v1430_v51, %v531_v57 }
 0x104   :  { %v1123_v56 = vpack.c.bf16 %v742_v55, %v741_v54  ;;  %v481_v58 = vpop.f32.mrf.mxu2  ;;  %v727_v2 = vmax.f32 %v695_v62, 0.0 }
 0x105   :  { %v570_v59 = vpop.f32.mrf.mxu3 }
 0x106   :  { %1147 = vst [vmem:[%s1515_s3 + $0x68] sm:$0xff] %v1123_v56   ;;  %v443_v60 = vpop.f32.mrf.mxu0  ;;  %v571_v0 = vadd.f32 %v570_v59, %v481_v58 }
 0x107   :  { %v532_v61 = vpop.f32.mrf.mxu1 }
 0x108   :  { %v533_v63 = vadd.f32 %v532_v61, %v443_v60  ;;  %v711_v6 = vadd.f32 %v1430_v51, %v571_v0 }
 0x10a   :  { %v696_v1 = vadd.f32 %v1430_v51, %v533_v63  ;;  %v743_v12 = vmax.f32 %v711_v6, 0.0 }
 0x10c   :  { %v728_v3 = vmax.f32 %v696_v1, 0.0  ;;  %v483_v4 = vpop.f32.mrf.mxu2 }
 0x10d   :  { %v572_v5 = vpop.f32.mrf.mxu3 }
 0x10e   :  { %v1088_v7 = vpack.c.bf16 %v728_v3, %v727_v2  ;;  %v573_v8 = vadd.f32 %v572_v5, %v483_v4  ;;  %v446_v9 = vpop.f32.mrf.mxu0 }
 0x10f   :  { %v535_v10 = vpop.f32.mrf.mxu1 }
 0x110   :  { %1140 = vst [vmem:[%s1515_s3 + $0x30] sm:$0xff] %v1088_v7   ;;  %v712_v11 = vadd.f32 %v1430_v51, %v573_v8  ;;  %v536_v15 = vadd.f32 %v535_v10, %v446_v9 }
 0x112   :  { %v744_v13 = vmax.f32 %v712_v11, 0.0  ;;  %v697_v20 = vadd.f32 %v1430_v51, %v536_v15 }
 0x114   :  { %v1128_v14 = vpack.c.bf16 %v744_v13, %v743_v12  ;;  %v486_v16 = vpop.f32.mrf.mxu2  ;;  %v729_v24 = vmax.f32 %v697_v20, 0.0 }
 0x115   :  { %v575_v17 = vpop.f32.mrf.mxu3 }
 0x116   :  { %1148 = vst [vmem:[%s1515_s3 + $0x70] sm:$0xff] %v1128_v14   ;;  %v448_v18 = vpop.f32.mrf.mxu0  ;;  %v576_v22 = vadd.f32 %v575_v17, %v486_v16 }
 0x117   :  { %v537_v19 = vpop.f32.mrf.mxu1 }
 0x118   :  { %v538_v21 = vadd.f32 %v537_v19, %v448_v18  ;;  %v713_v28 = vadd.f32 %v1430_v51, %v576_v22 }
 0x11a   :  { %v698_v23 = vadd.f32 %v1430_v51, %v538_v21  ;;  %v745_v32 = vmax.f32 %v713_v28, 0.0 }
 0x11c   :  { %v730_v25 = vmax.f32 %v698_v23, 0.0  ;;  %v488_v26 = vpop.f32.mrf.mxu2 }
 0x11d   :  { %v577_v27 = vpop.f32.mrf.mxu3 }
 0x11e   :  { %v1093_v29 = vpack.c.bf16 %v730_v25, %v729_v24  ;;  %v578_v30 = vadd.f32 %v577_v27, %v488_v26 }
 0x120   :  { %1141 = vst [vmem:[%s1515_s3 + $0x38] sm:$0xff] %v1093_v29   ;;  %v714_v31 = vadd.f32 %v1430_v51, %v578_v30 }
 0x122   :  { %v746_v33 = vmax.f32 %v714_v31, 0.0 }
 0x124   :  { %v1133_v34 = vpack.c.bf16 %v746_v33, %v745_v32 }
 0x126   :  { %1149 = vst [vmem:[%s1515_s3 + $0x78] sm:$0xff] %v1133_v34  }

</bundles_post_ra>
